<compile_context>
chip_gen: v7x
topology: tpu7x:2x2x1
jax: 0.10.0
libtpu: 0.0.40
codegen_flags: <defaults>
</compile_context>

<pallas_src>
import functools

import jax
import jax.numpy as jnp
import numpy as np
from jax import lax
from jax.experimental import pallas as pl
from jax.experimental.pallas import tpu as pltpu


def _round_up(x, m):
    return ((x + m - 1) // m) * m


# ----------------------------------------------------------------------------
# Parameter initialization (deterministic, synthetic weights).
# Flat list layout (all 2-D, already transposed to (in, out); biases (1, out)):
#   encoder VEFilm (1->H):  Wl(1,H) bl(1,H) Ws(C,H) bs(1,H) Wh(C,H) bh(1,H)
#   each encoder FilmResBlock: Wl(H,H) bl Ws(C,H) bs Wh(C,H) bh Wc(H,H) bc
#   each CoreResBlock:         W1(H,H) b1 W2(H,H) b2
#   each decoder FilmResBlock: (same 8 as encoder block)
#   decoder InvVEFilm (H->1):  Ws(C,H) bs Wh(C,H) bh Wl_row(1,H) bl(1,1)
# ----------------------------------------------------------------------------
def init_params(key, context_size, hidden_size,
                num_encoder_layers, num_core_layers, num_decoder_layers):
    C, H = context_size, hidden_size
    params = []

    def nxt(shape):
        nonlocal key
        key, sub = jax.random.split(key)
        return jax.random.normal(sub, shape, jnp.float32) * 0.1

    params += [nxt((1, H)), nxt((1, H)), nxt((C, H)), nxt((1, H)),
               nxt((C, H)), nxt((1, H))]
    for _ in range(num_encoder_layers - 1):
        params += [nxt((H, H)), nxt((1, H)), nxt((C, H)), nxt((1, H)),
                   nxt((C, H)), nxt((1, H)), nxt((H, H)), nxt((1, H))]
    for _ in range(num_core_layers):
        params += [nxt((H, H)), nxt((1, H)), nxt((H, H)), nxt((1, H))]
    for _ in range(num_decoder_layers - 1):
        params += [nxt((H, H)), nxt((1, H)), nxt((C, H)), nxt((1, H)),
                   nxt((C, H)), nxt((1, H)), nxt((H, H)), nxt((1, H))]
    params += [nxt((C, H)), nxt((1, H)), nxt((C, H)), nxt((1, H)),
               nxt((1, H)), nxt((1, 1))]
    return params


# ----------------------------------------------------------------------------
# Pallas kernel: one batch tile (TB examples) per grid step.  All weight /
# FiLM tensors are grid-constant (index_map all-zeros), so they are DMA'd once
# and stay resident in VMEM across the whole batch grid.
#
# Operand order after x_ref (operands with count 0 are omitted entirely):
#   enc0    (2, Vin, H)          : [g*Wl, g*bl + s] of the encoder VEFilm
#   gs_in   (2*n_enc_b, TB*Vin,H): per encoder block [g_tiled, C_tiled]
#   gs_out  (2*n_dec_b, TB*Vout,H): per decoder block [g_tiled, C_tiled]
#   w_hh    (nW, H, H)           : enc (Wl,Wc)* , core (W1,W2)*, dec (Wl,Wc)*
#   bias_h  (nB, H)              : enc bc*, core b1,b2*, dec bc*
#   Gf      (Vout, H)            : final gain * Wl_row
#   bout    (1, Vout)            : sum(shift*Wl_row,-1) + final bias
# ----------------------------------------------------------------------------
def tom_kernel(n_enc_b, n_core, n_dec_b, tb, v_in, v_out, hidden, *refs):
    refs = list(refs)
    x_ref = refs.pop(0)
    enc0_ref = refs.pop(0)
    gs_in_ref = refs.pop(0) if n_enc_b > 0 else None
    gs_out_ref = refs.pop(0) if n_dec_b > 0 else None
    has_hh = (n_enc_b + n_core + n_dec_b) > 0
    w_hh_ref = refs.pop(0) if has_hh else None
    bias_ref = refs.pop(0) if has_hh else None
    gf_ref = refs.pop(0)
    bout_ref = refs.pop(0)
    out_ref = refs.pop(0)
    assert not refs

    def mm2(a, w):                       # 2-D matmul on the MXU, f32 accumulate
        return jnp.dot(a.astype(w.dtype), w, preferred_element_type=jnp.float32)

    biases = bias_ref[...] if has_hh else None     # (nB, H), one small tile
    bi = 0
    wi = 0

    xb = x_ref[...]                                # (tb, Vin), lane-dense

    # ---- encoder VEFilm (1 -> H), bias folded:  h = x * A0 + C0 ------------
    A0 = enc0_ref[0]                               # (Vin, H)
    C0 = enc0_ref[1]
    h3 = xb[:, :, None] * A0[None] + C0[None]      # (tb, Vin, H)
    h = h3.reshape(tb * v_in, hidden)              # 2-D for the whole encoder

    # ---- encoder FilmResBlocks (2-D, no per-block reshapes) -----------------
    for i in range(n_enc_b):
        g = gs_in_ref[2 * i]                       # (tb*Vin, H), batch-tiled
        Cs = gs_in_ref[2 * i + 1]
        Wl = w_hh_ref[wi]
        Wc = w_hh_ref[wi + 1]
        wi += 2
        bc = biases[bi:bi + 1]
        bi += 1
        t = jax.nn.relu(g * mm2(h, Wl) + Cs)
        t = mm2(t, Wc) + bc
        h = jax.nn.relu(h + t)

    # ---- sum over input variables (torch.sum(x, dim=-1, keepdim=True)) -----
    c = jnp.sum(h.reshape(tb, v_in, hidden), axis=1)     # (tb, H)

    # ---- CoreResBlocks (M = tb rows) ----------------------------------------
    for _ in range(n_core):
        W1 = w_hh_ref[wi]
        W2 = w_hh_ref[wi + 1]
        wi += 2
        b1 = biases[bi:bi + 1]
        b2 = biases[bi + 1:bi + 2]
        bi += 2
        t = jax.nn.relu(mm2(c, W1) + b1)
        t = mm2(t, W2) + b2
        c = jax.nn.relu(c + t)

    # ---- decoder: expand over output variables ------------------------------
    def bcast_rows(a2):                  # (tb, H) -> (tb*v_out, H), b-major
        return jnp.broadcast_to(
            a2[:, None, :], (tb, v_out, hidden)).reshape(tb * v_out, hidden)

    c_b = bcast_rows(c)

    if n_dec_b > 0:
        # First decoder block: all output-variable rows of a batch element are
        # identical (= c), so the Wl matmul runs with M=tb and is broadcast.
        g = gs_out_ref[0]
        Cs = gs_out_ref[1]
        Wl = w_hh_ref[wi]
        Wc = w_hh_ref[wi + 1]
        wi += 2
        bc = biases[bi:bi + 1]
        bi += 1
        p_b = bcast_rows(mm2(c, Wl))                      # (tb*v_out, H)
        t = jax.nn.relu(g * p_b + Cs)
        t = mm2(t, Wc) + bc
        h = jax.nn.relu(c_b + t)
        for i in range(1, n_dec_b):
            g = gs_out_ref[2 * i]
            Cs = gs_out_ref[2 * i + 1]
            Wl = w_hh_ref[wi]
            Wc = w_hh_ref[wi + 1]
            wi += 2
            bc = biases[bi:bi + 1]
            bi += 1
            t = jax.nn.relu(g * mm2(h, Wl) + Cs)
            t = mm2(t, Wc) + bc
            h = jax.nn.relu(h + t)
    else:
        h = c_b

    # ---- decoder InvVEFilm (H -> 1), Wl_row folded ---------------------------
    Gf = gf_ref[...]                                      # (v_out, H)
    h3 = h.reshape(tb, v_out, hidden)
    y = jnp.sum(h3 * Gf[None], axis=2) + bout_ref[...]    # (tb, v_out)
    out_ref[...] = y.astype(out_ref.dtype)


# ----------------------------------------------------------------------------
# Wrapper: hoist + fold batch-invariant FiLM tensors, pack operands, tile the
# batch, and call pallas_call.
# ----------------------------------------------------------------------------
def tom_forward(input_batch, input_contexts, output_contexts, params,
                hidden_size, num_encoder_layers, num_core_layers,
                num_decoder_layers, batch_tile=256, param_dtype=jnp.float32):
    B, Vin = input_batch.shape
    Vout = output_contexts.shape[1]
    H = hidden_size

    n_enc_b = num_encoder_layers - 1
    n_core = num_core_layers
    n_dec_b = num_decoder_layers - 1

    # ---- batch tile: multiple of 8, keep >= 2 grid steps when possible -----
    TB = _round_up(max(1, min(batch_tile, B)), 8)
    Bp0 = _round_up(B, 8)
    TB = min(TB, Bp0)
    if TB == Bp0 and Bp0 >= 16:
        TB = _round_up(Bp0 // 2, 8)          # keep both TCs busy on v7x
    Bp = _round_up(B, TB)

    x = input_batch.astype(jnp.float32)
    if Bp != B:
        x = jnp.pad(x, ((0, Bp - B), (0, 0)))     # padded rows are discarded

    # ---- hoist FiLM context matmuls and fold linear biases -----------------
    HP = lax.Precision.HIGHEST
    mm = lambda a, b: jnp.dot(a, b, precision=HP)
    zin = input_contexts.T.astype(jnp.float32)        # (Vin, C)
    zout = output_contexts.T.astype(jnp.float32)      # (Vout, C)

    w = list(params)

    def pop(n):
        vals = w[:n]
        del w[:n]
        return vals

    def tile_b(t):                        # (V, H) -> (TB*V, H), batch-major
        V = t.shape[0]
        return jnp.broadcast_to(t[None], (TB, V, H)).reshape(TB * V, H)

    # encoder VEFilm (1 -> H):  g*(x*Wl + bl) + s  ==  x*(g*Wl) + (g*bl + s)
    Wl, bl, Ws, bs, Wh, bh = pop(6)
    g = mm(zin, Ws) + bs
    s = mm(zin, Wh) + bh
    enc0 = jnp.stack([g * Wl, g * bl + s])            # (2, Vin, H)

    gs_in, gs_out, w_hh, bias_h = [], [], [], []
    for _ in range(n_enc_b):
        Wl, bl, Ws, bs, Wh, bh, Wc, bc = pop(8)
        g = mm(zin, Ws) + bs
        s = mm(zin, Wh) + bh
        gs_in += [tile_b(g), tile_b(g * bl + s)]       # bias folded into shift
        w_hh += [Wl, Wc]
        bias_h += [bc]
    for _ in range(n_core):
        W1, b1, W2, b2 = pop(4)
        w_hh += [W1, W2]
        bias_h += [b1, b2]
    for _ in range(n_dec_b):
        Wl, bl, Ws, bs, Wh, bh, Wc, bc = pop(8)
        g = mm(zout, Ws) + bs
        s = mm(zout, Wh) + bh
        gs_out += [tile_b(g), tile_b(g * bl + s)]
        w_hh += [Wl, Wc]
        bias_h += [bc]
    # decoder InvVEFilm (H -> 1):  sum((g*h + s)*Wl_row) + bl
    #   == sum(h * (g*Wl_row)) + (sum(s*Wl_row) + bl)
    Ws, bs, Wh, bh, Wl_row, blf = pop(6)
    g = mm(zout, Ws) + bs
    s = mm(zout, Wh) + bh
    Gf = g * Wl_row                                             # (Vout, H)
    bout = (jnp.sum(s * Wl_row, axis=-1) + blf[0, 0])[None, :]  # (1, Vout)
    assert not w

    # ---- pack operands (few big arrays instead of dozens of tiny tiles) ----
    cast = lambda t: t.astype(param_dtype)
    ops = [cast(enc0)]
    if n_enc_b:
        ops.append(cast(jnp.stack(gs_in)))            # (2*n_enc_b, TB*Vin, H)
    if n_dec_b:
        ops.append(cast(jnp.stack(gs_out)))           # (2*n_dec_b, TB*Vout, H)
    if n_enc_b + n_core + n_dec_b:
        ops.append(cast(jnp.stack(w_hh)))             # (nW, H, H)
        ops.append(cast(jnp.concatenate(bias_h, 0)))  # (nB, H)
    ops += [cast(Gf), bout.astype(jnp.float32)]

    kernel = functools.partial(tom_kernel, n_enc_b, n_core, n_dec_b,
                               TB, Vin, Vout, H)

    in_specs = [pl.BlockSpec((TB, Vin), lambda b: (b, 0))]
    # Grid-constant operands: block index never changes -> DMA'd once, stay
    # resident in VMEM for the whole batch grid.
    in_specs += [pl.BlockSpec(o.shape, lambda b, nd=o.ndim: (0,) * nd)
                 for o in ops]

    out = pl.pallas_call(
        kernel,
        out_shape=jax.ShapeDtypeStruct((Bp, Vout), jnp.float32),
        grid=(Bp // TB,),
        in_specs=in_specs,
        out_specs=pl.BlockSpec((TB, Vout), lambda b: (b, 0)),
        compiler_params=pltpu.CompilerParams(
            dimension_semantics=("parallel",),       # shard batch tiles (v7x)
            vmem_limit_bytes=48 * 1024 * 1024,       # fits v7x's 64 MiB VMEM
        ),
    )(x, *ops)

    return out[:B]                                    # (B, Vout)


# ----------------------------------------------------------------------------
# Pure-JAX reference (same math, batched) for correctness checking.
# ----------------------------------------------------------------------------
def reference_forward(input_batch, input_contexts, output_contexts, params,
                      hidden_size, num_encoder_layers, num_core_layers,
                      num_decoder_layers):
    HP = lax.Precision.HIGHEST
    mm = lambda a, b: jnp.dot(a, b, precision=HP)
    Vout = output_contexts.shape[-1]
    H = hidden_size
    w = list(params)

    def pop(n):
        vals = w[:n]
        del w[:n]
        return vals

    x = input_batch.astype(jnp.float32)[:, :, None]      # (B, Vin, 1)
    zin = input_contexts.T.astype(jnp.float32)           # (Vin, C)
    zout = output_contexts.T.astype(jnp.float32)         # (Vout, C)

    Wl, bl, Ws, bs, Wh, bh = pop(6)
    g = mm(zin, Ws) + bs
    s = mm(zin, Wh) + bh
    h = g * (x * Wl + bl) + s                            # (B, Vin, H)

    for _ in range(num_encoder_layers - 1):
        Wl, bl, Ws, bs, Wh, bh, Wc, bc = pop(8)
        g = mm(zin, Ws) + bs
        s = mm(zin, Wh) + bh
        t = jax.nn.relu(g * (mm(h, Wl) + bl) + s)
        t = mm(t, Wc) + bc
        h = jax.nn.relu(h + t)

    c = jnp.sum(h, axis=1, keepdims=True)                # (B, 1, H)

    for _ in range(num_core_layers):
        W1, b1, W2, b2 = pop(4)
        t = jax.nn.relu(mm(c, W1) + b1)
        t = mm(t, W2) + b2
        c = jax.nn.relu(c + t)

    h = jnp.broadcast_to(c, (c.shape[0], Vout, H))

    for _ in range(num_decoder_layers - 1):
        Wl, bl, Ws, bs, Wh, bh, Wc, bc = pop(8)
        g = mm(zout, Ws) + bs
        s = mm(zout, Wh) + bh
        t = jax.nn.relu(g * (mm(h, Wl) + bl) + s)
        t = mm(t, Wc) + bc
        h = jax.nn.relu(h + t)

    Ws, bs, Wh, bh, Wl_row, bl = pop(6)
    g = mm(zout, Ws) + bs
    s = mm(zout, Wh) + bh
    u = g * h + s
    y = jnp.sum(u * Wl_row, axis=-1) + bl[0, 0]
    return y                                             # (B, Vout)


if __name__ == "__main__":
    # Small deterministic configuration (B chosen so two batch tiles run).
    B = 32                # batch size
    Vin = 16              # number of input variables
    Vout = 8              # number of output variables
    context_size = 4
    hidden_size = 32
    num_encoder_layers = 2
    num_core_layers = 2
    num_decoder_layers = 2

    key = jax.random.PRNGKey(0)
    k1, k2, k3, k4 = jax.random.split(key, 4)
    input_batch = jax.random.normal(k1, (B, Vin), jnp.float32)
    input_contexts = jax.random.normal(k2, (context_size, Vin), jnp.float32)
    output_contexts = jax.random.normal(k3, (context_size, Vout), jnp.float32)

    params = init_params(k4, context_size, hidden_size,
                         num_encoder_layers, num_core_layers,
                         num_decoder_layers)

    out = tom_forward(input_batch, input_contexts, output_contexts, params,
                      hidden_size, num_encoder_layers, num_core_layers,
                      num_decoder_layers)
    out = jax.block_until_ready(out)

    ref = reference_forward(input_batch, input_contexts, output_contexts,
                            params, hidden_size, num_encoder_layers,
                            num_core_layers, num_decoder_layers)

    assert out.shape == (B, Vout)
    np.testing.assert_allclose(np.asarray(out), np.asarray(ref),
                               rtol=1e-2, atol=2e-3)
    print("KERNEL_OK")
</pallas_src>

<mosaic_0001>
module attributes {stable_mosaic.version = 11 : i64} {
  func.func @tom_kernel(%arg0: i32, %arg1: memref<16x16xf32, #tpu.memory_space<vmem>>, %arg2: memref<2x16x32xf32, #tpu.memory_space<vmem>>, %arg3: memref<2x256x32xf32, #tpu.memory_space<vmem>>, %arg4: memref<2x128x32xf32, #tpu.memory_space<vmem>>, %arg5: memref<8x32x32xf32, #tpu.memory_space<vmem>>, %arg6: memref<6x32xf32, #tpu.memory_space<vmem>>, %arg7: memref<8x32xf32, #tpu.memory_space<vmem>>, %arg8: memref<1x8xf32, #tpu.memory_space<vmem>>, %arg9: memref<16x8xf32, #tpu.memory_space<vmem>>) attributes {dimension_semantics = [#tpu.dimension_semantics<parallel>], iteration_bounds = array<i64: 2>, scalar_prefetch = 0 : i64, scratch_operands = 0 : i64, tpu.core_type = #tpu.core_type<tc>, window_params = [{transform_indices = @transform_0, window_bounds = array<i64: 16, 16>}, {pipeline_mode = #tpu.pipeline_mode<synchronous>, transform_indices = @transform_1, window_bounds = array<i64: 2, 16, 32>}, {pipeline_mode = #tpu.pipeline_mode<synchronous>, transform_indices = @transform_2, window_bounds = array<i64: 2, 256, 32>}, {pipeline_mode = #tpu.pipeline_mode<synchronous>, transform_indices = @transform_3, window_bounds = array<i64: 2, 128, 32>}, {pipeline_mode = #tpu.pipeline_mode<synchronous>, transform_indices = @transform_4, window_bounds = array<i64: 8, 32, 32>}, {pipeline_mode = #tpu.pipeline_mode<synchronous>, transform_indices = @transform_5, window_bounds = array<i64: 6, 32>}, {pipeline_mode = #tpu.pipeline_mode<synchronous>, transform_indices = @transform_6, window_bounds = array<i64: 8, 32>}, {pipeline_mode = #tpu.pipeline_mode<synchronous>, transform_indices = @transform_7, window_bounds = array<i64: 1, 8>}, {transform_indices = @transform_8, window_bounds = array<i64: 16, 8>}]} {
    %c0 = arith.constant 0 : index
    %c0_0 = arith.constant 0 : index
    %0 = vector.load %arg6[%c0, %c0_0] : memref<6x32xf32, #tpu.memory_space<vmem>>, vector<6x32xf32>
    %c0_1 = arith.constant 0 : index
    %c0_2 = arith.constant 0 : index
    %1 = vector.load %arg1[%c0_1, %c0_2] : memref<16x16xf32, #tpu.memory_space<vmem>>, vector<16x16xf32>
    %c0_3 = arith.constant 0 : index
    %c0_4 = arith.constant 0 : index
    %c0_5 = arith.constant 0 : index
    %2 = vector.load %arg2[%c0_3, %c0_4, %c0_5] : memref<2x16x32xf32, #tpu.memory_space<vmem>>, vector<1x16x32xf32>
    %3 = vector.shape_cast %2 : vector<1x16x32xf32> to vector<16x32xf32>
    %c1 = arith.constant 1 : index
    %c0_6 = arith.constant 0 : index
    %c0_7 = arith.constant 0 : index
    %4 = vector.load %arg2[%c1, %c0_6, %c0_7] : memref<2x16x32xf32, #tpu.memory_space<vmem>>, vector<1x16x32xf32>
    %5 = vector.shape_cast %4 : vector<1x16x32xf32> to vector<16x32xf32>
    %6 = vector.shape_cast %1 : vector<16x16xf32> to vector<16x16x1xf32>
    %7 = vector.shape_cast %3 : vector<16x32xf32> to vector<1x16x32xf32>
    %8 = vector.broadcast %6 : vector<16x16x1xf32> to vector<16x16x32xf32>
    %9 = vector.broadcast %7 : vector<1x16x32xf32> to vector<16x16x32xf32>
    %10 = arith.mulf %8, %9 : vector<16x16x32xf32>
    %11 = vector.shape_cast %5 : vector<16x32xf32> to vector<1x16x32xf32>
    %12 = vector.broadcast %11 : vector<1x16x32xf32> to vector<16x16x32xf32>
    %13 = arith.addf %10, %12 : vector<16x16x32xf32>
    %14 = vector.shape_cast %13 : vector<16x16x32xf32> to vector<256x32xf32>
    %c0_8 = arith.constant 0 : index
    %c0_9 = arith.constant 0 : index
    %c0_10 = arith.constant 0 : index
    %15 = vector.load %arg3[%c0_8, %c0_9, %c0_10] : memref<2x256x32xf32, #tpu.memory_space<vmem>>, vector<1x256x32xf32>
    %16 = vector.shape_cast %15 : vector<1x256x32xf32> to vector<256x32xf32>
    %c1_11 = arith.constant 1 : index
    %c0_12 = arith.constant 0 : index
    %c0_13 = arith.constant 0 : index
    %17 = vector.load %arg3[%c1_11, %c0_12, %c0_13] : memref<2x256x32xf32, #tpu.memory_space<vmem>>, vector<1x256x32xf32>
    %18 = vector.shape_cast %17 : vector<1x256x32xf32> to vector<256x32xf32>
    %c0_14 = arith.constant 0 : index
    %c0_15 = arith.constant 0 : index
    %c0_16 = arith.constant 0 : index
    %19 = vector.load %arg5[%c0_14, %c0_15, %c0_16] : memref<8x32x32xf32, #tpu.memory_space<vmem>>, vector<1x32x32xf32>
    %20 = vector.shape_cast %19 : vector<1x32x32xf32> to vector<32x32xf32>
    %c1_17 = arith.constant 1 : index
    %c0_18 = arith.constant 0 : index
    %c0_19 = arith.constant 0 : index
    %21 = vector.load %arg5[%c1_17, %c0_18, %c0_19] : memref<8x32x32xf32, #tpu.memory_space<vmem>>, vector<1x32x32xf32>
    %22 = vector.shape_cast %21 : vector<1x32x32xf32> to vector<32x32xf32>
    %23 = vector.extract_strided_slice %0 {offsets = [0, 0], sizes = [1, 32], strides = [1, 1]} : vector<6x32xf32> to vector<1x32xf32>
    %cst = arith.constant dense<0.000000e+00> : vector<256x32xf32>
    %24 = tpu.matmul %14, %20, %cst {dimension_numbers = #tpu.dot_dimension_numbers<[1], [0], [0], [1], [0, 0, 1, 1], [], []>} : vector<256x32xf32>, vector<32x32xf32>, vector<256x32xf32> -> vector<256x32xf32>
    %25 = arith.mulf %16, %24 : vector<256x32xf32>
    %26 = arith.addf %25, %18 : vector<256x32xf32>
    %cst_20 = arith.constant 0.000000e+00 : f32
    %27 = vector.broadcast %cst_20 : f32 to vector<256x32xf32>
    %28 = arith.maximumf %26, %27 : vector<256x32xf32>
    %cst_21 = arith.constant dense<0.000000e+00> : vector<256x32xf32>
    %29 = tpu.matmul %28, %22, %cst_21 {dimension_numbers = #tpu.dot_dimension_numbers<[1], [0], [0], [1], [0, 0, 1, 1], [], []>} : vector<256x32xf32>, vector<32x32xf32>, vector<256x32xf32> -> vector<256x32xf32>
    %30 = vector.broadcast %23 : vector<1x32xf32> to vector<256x32xf32>
    %31 = arith.addf %29, %30 : vector<256x32xf32>
    %32 = arith.addf %14, %31 : vector<256x32xf32>
    %cst_22 = arith.constant 0.000000e+00 : f32
    %33 = vector.broadcast %cst_22 : f32 to vector<256x32xf32>
    %34 = arith.maximumf %32, %33 : vector<256x32xf32>
    %35 = vector.shape_cast %34 : vector<256x32xf32> to vector<16x16x32xf32>
    %cst_23 = arith.constant dense<0.000000e+00> : vector<16x32xf32>
    %36 = vector.multi_reduction <add>, %35, %cst_23 [1] : vector<16x16x32xf32> to vector<16x32xf32>
    %c2 = arith.constant 2 : index
    %c0_24 = arith.constant 0 : index
    %c0_25 = arith.constant 0 : index
    %37 = vector.load %arg5[%c2, %c0_24, %c0_25] : memref<8x32x32xf32, #tpu.memory_space<vmem>>, vector<1x32x32xf32>
    %38 = vector.shape_cast %37 : vector<1x32x32xf32> to vector<32x32xf32>
    %c3 = arith.constant 3 : index
    %c0_26 = arith.constant 0 : index
    %c0_27 = arith.constant 0 : index
    %39 = vector.load %arg5[%c3, %c0_26, %c0_27] : memref<8x32x32xf32, #tpu.memory_space<vmem>>, vector<1x32x32xf32>
    %40 = vector.shape_cast %39 : vector<1x32x32xf32> to vector<32x32xf32>
    %41 = vector.extract_strided_slice %0 {offsets = [1, 0], sizes = [1, 32], strides = [1, 1]} : vector<6x32xf32> to vector<1x32xf32>
    %42 = vector.extract_strided_slice %0 {offsets = [2, 0], sizes = [1, 32], strides = [1, 1]} : vector<6x32xf32> to vector<1x32xf32>
    %cst_28 = arith.constant dense<0.000000e+00> : vector<16x32xf32>
    %43 = tpu.matmul %36, %38, %cst_28 {dimension_numbers = #tpu.dot_dimension_numbers<[1], [0], [0], [1], [0, 0, 1, 1], [], []>} : vector<16x32xf32>, vector<32x32xf32>, vector<16x32xf32> -> vector<16x32xf32>
    %44 = vector.broadcast %41 : vector<1x32xf32> to vector<16x32xf32>
    %45 = arith.addf %43, %44 : vector<16x32xf32>
    %cst_29 = arith.constant 0.000000e+00 : f32
    %46 = vector.broadcast %cst_29 : f32 to vector<16x32xf32>
    %47 = arith.maximumf %45, %46 : vector<16x32xf32>
    %cst_30 = arith.constant dense<0.000000e+00> : vector<16x32xf32>
    %48 = tpu.matmul %47, %40, %cst_30 {dimension_numbers = #tpu.dot_dimension_numbers<[1], [0], [0], [1], [0, 0, 1, 1], [], []>} : vector<16x32xf32>, vector<32x32xf32>, vector<16x32xf32> -> vector<16x32xf32>
    %49 = vector.broadcast %42 : vector<1x32xf32> to vector<16x32xf32>
    %50 = arith.addf %48, %49 : vector<16x32xf32>
    %51 = arith.addf %36, %50 : vector<16x32xf32>
    %cst_31 = arith.constant 0.000000e+00 : f32
    %52 = vector.broadcast %cst_31 : f32 to vector<16x32xf32>
    %53 = arith.maximumf %51, %52 : vector<16x32xf32>
    %c4 = arith.constant 4 : index
    %c0_32 = arith.constant 0 : index
    %c0_33 = arith.constant 0 : index
    %54 = vector.load %arg5[%c4, %c0_32, %c0_33] : memref<8x32x32xf32, #tpu.memory_space<vmem>>, vector<1x32x32xf32>
    %55 = vector.shape_cast %54 : vector<1x32x32xf32> to vector<32x32xf32>
    %c5 = arith.constant 5 : index
    %c0_34 = arith.constant 0 : index
    %c0_35 = arith.constant 0 : index
    %56 = vector.load %arg5[%c5, %c0_34, %c0_35] : memref<8x32x32xf32, #tpu.memory_space<vmem>>, vector<1x32x32xf32>
    %57 = vector.shape_cast %56 : vector<1x32x32xf32> to vector<32x32xf32>
    %58 = vector.extract_strided_slice %0 {offsets = [3, 0], sizes = [1, 32], strides = [1, 1]} : vector<6x32xf32> to vector<1x32xf32>
    %59 = vector.extract_strided_slice %0 {offsets = [4, 0], sizes = [1, 32], strides = [1, 1]} : vector<6x32xf32> to vector<1x32xf32>
    %cst_36 = arith.constant dense<0.000000e+00> : vector<16x32xf32>
    %60 = tpu.matmul %53, %55, %cst_36 {dimension_numbers = #tpu.dot_dimension_numbers<[1], [0], [0], [1], [0, 0, 1, 1], [], []>} : vector<16x32xf32>, vector<32x32xf32>, vector<16x32xf32> -> vector<16x32xf32>
    %61 = vector.broadcast %58 : vector<1x32xf32> to vector<16x32xf32>
    %62 = arith.addf %60, %61 : vector<16x32xf32>
    %cst_37 = arith.constant 0.000000e+00 : f32
    %63 = vector.broadcast %cst_37 : f32 to vector<16x32xf32>
    %64 = arith.maximumf %62, %63 : vector<16x32xf32>
    %cst_38 = arith.constant dense<0.000000e+00> : vector<16x32xf32>
    %65 = tpu.matmul %64, %57, %cst_38 {dimension_numbers = #tpu.dot_dimension_numbers<[1], [0], [0], [1], [0, 0, 1, 1], [], []>} : vector<16x32xf32>, vector<32x32xf32>, vector<16x32xf32> -> vector<16x32xf32>
    %66 = vector.broadcast %59 : vector<1x32xf32> to vector<16x32xf32>
    %67 = arith.addf %65, %66 : vector<16x32xf32>
    %68 = arith.addf %53, %67 : vector<16x32xf32>
    %cst_39 = arith.constant 0.000000e+00 : f32
    %69 = vector.broadcast %cst_39 : f32 to vector<16x32xf32>
    %70 = arith.maximumf %68, %69 : vector<16x32xf32>
    %71 = vector.shape_cast %70 : vector<16x32xf32> to vector<16x1x32xf32>
    %72 = vector.shape_cast %71 : vector<16x1x32xf32> to vector<16x1x32xf32>
    %73 = vector.broadcast %72 : vector<16x1x32xf32> to vector<16x8x32xf32>
    %74 = vector.shape_cast %73 : vector<16x8x32xf32> to vector<128x32xf32>
    %c0_40 = arith.constant 0 : index
    %c0_41 = arith.constant 0 : index
    %c0_42 = arith.constant 0 : index
    %75 = vector.load %arg4[%c0_40, %c0_41, %c0_42] : memref<2x128x32xf32, #tpu.memory_space<vmem>>, vector<1x128x32xf32>
    %76 = vector.shape_cast %75 : vector<1x128x32xf32> to vector<128x32xf32>
    %c1_43 = arith.constant 1 : index
    %c0_44 = arith.constant 0 : index
    %c0_45 = arith.constant 0 : index
    %77 = vector.load %arg4[%c1_43, %c0_44, %c0_45] : memref<2x128x32xf32, #tpu.memory_space<vmem>>, vector<1x128x32xf32>
    %78 = vector.shape_cast %77 : vector<1x128x32xf32> to vector<128x32xf32>
    %c6 = arith.constant 6 : index
    %c0_46 = arith.constant 0 : index
    %c0_47 = arith.constant 0 : index
    %79 = vector.load %arg5[%c6, %c0_46, %c0_47] : memref<8x32x32xf32, #tpu.memory_space<vmem>>, vector<1x32x32xf32>
    %80 = vector.shape_cast %79 : vector<1x32x32xf32> to vector<32x32xf32>
    %c7 = arith.constant 7 : index
    %c0_48 = arith.constant 0 : index
    %c0_49 = arith.constant 0 : index
    %81 = vector.load %arg5[%c7, %c0_48, %c0_49] : memref<8x32x32xf32, #tpu.memory_space<vmem>>, vector<1x32x32xf32>
    %82 = vector.shape_cast %81 : vector<1x32x32xf32> to vector<32x32xf32>
    %83 = vector.extract_strided_slice %0 {offsets = [5, 0], sizes = [1, 32], strides = [1, 1]} : vector<6x32xf32> to vector<1x32xf32>
    %cst_50 = arith.constant dense<0.000000e+00> : vector<16x32xf32>
    %84 = tpu.matmul %70, %80, %cst_50 {dimension_numbers = #tpu.dot_dimension_numbers<[1], [0], [0], [1], [0, 0, 1, 1], [], []>} : vector<16x32xf32>, vector<32x32xf32>, vector<16x32xf32> -> vector<16x32xf32>
    %85 = vector.shape_cast %84 : vector<16x32xf32> to vector<16x1x32xf32>
    %86 = vector.shape_cast %85 : vector<16x1x32xf32> to vector<16x1x32xf32>
    %87 = vector.broadcast %86 : vector<16x1x32xf32> to vector<16x8x32xf32>
    %88 = vector.shape_cast %87 : vector<16x8x32xf32> to vector<128x32xf32>
    %89 = arith.mulf %76, %88 : vector<128x32xf32>
    %90 = arith.addf %89, %78 : vector<128x32xf32>
    %cst_51 = arith.constant 0.000000e+00 : f32
    %91 = vector.broadcast %cst_51 : f32 to vector<128x32xf32>
    %92 = arith.maximumf %90, %91 : vector<128x32xf32>
    %cst_52 = arith.constant dense<0.000000e+00> : vector<128x32xf32>
    %93 = tpu.matmul %92, %82, %cst_52 {dimension_numbers = #tpu.dot_dimension_numbers<[1], [0], [0], [1], [0, 0, 1, 1], [], []>} : vector<128x32xf32>, vector<32x32xf32>, vector<128x32xf32> -> vector<128x32xf32>
    %94 = vector.broadcast %83 : vector<1x32xf32> to vector<128x32xf32>
    %95 = arith.addf %93, %94 : vector<128x32xf32>
    %96 = arith.addf %74, %95 : vector<128x32xf32>
    %cst_53 = arith.constant 0.000000e+00 : f32
    %97 = vector.broadcast %cst_53 : f32 to vector<128x32xf32>
    %98 = arith.maximumf %96, %97 : vector<128x32xf32>
    %c0_54 = arith.constant 0 : index
    %c0_55 = arith.constant 0 : index
    %99 = vector.load %arg7[%c0_54, %c0_55] : memref<8x32xf32, #tpu.memory_space<vmem>>, vector<8x32xf32>
    %100 = vector.shape_cast %98 : vector<128x32xf32> to vector<16x8x32xf32>
    %101 = vector.shape_cast %99 : vector<8x32xf32> to vector<1x8x32xf32>
    %102 = vector.broadcast %101 : vector<1x8x32xf32> to vector<16x8x32xf32>
    %103 = arith.mulf %100, %102 : vector<16x8x32xf32>
    %cst_56 = arith.constant dense<0.000000e+00> : vector<16x8xf32>
    %104 = vector.multi_reduction <add>, %103, %cst_56 [2] : vector<16x8x32xf32> to vector<16x8xf32>
    %c0_57 = arith.constant 0 : index
    %c0_58 = arith.constant 0 : index
    %105 = vector.load %arg8[%c0_57, %c0_58] : memref<1x8xf32, #tpu.memory_space<vmem>>, vector<1x8xf32>
    %106 = vector.broadcast %105 : vector<1x8xf32> to vector<16x8xf32>
    %107 = arith.addf %104, %106 : vector<16x8xf32>
    %c0_59 = arith.constant 0 : index
    %c0_60 = arith.constant 0 : index
    %108 = vector.load %arg9[%c0_59, %c0_60] : memref<16x8xf32, #tpu.memory_space<vmem>>, vector<16x8xf32>
    tpu.vector_store %arg9[%c0_59, %c0_60], %107 {strides = array<i32>} : memref<16x8xf32, #tpu.memory_space<vmem>>, vector<16x8xf32>,
    return
  }
  func.func @transform_0(%arg0: i32) -> (i32, i32) {
    %c0_i32 = arith.constant 0 : i32
    %c0_i32_0 = arith.constant 0 : i32
    return %arg0, %c0_i32 : i32, i32
  }
  func.func @transform_1(%arg0: i32) -> (i32, i32, i32) {
    %c0_i32 = arith.constant 0 : i32
    %c0_i32_0 = arith.constant 0 : i32
    %c0_i32_1 = arith.constant 0 : i32
    %c0_i32_2 = arith.constant 0 : i32
    return %c0_i32, %c0_i32_0, %c0_i32_1 : i32, i32, i32
  }
  func.func @transform_2(%arg0: i32) -> (i32, i32, i32) {
    %c0_i32 = arith.constant 0 : i32
    %c0_i32_0 = arith.constant 0 : i32
    %c0_i32_1 = arith.constant 0 : i32
    %c0_i32_2 = arith.constant 0 : i32
    return %c0_i32, %c0_i32_0, %c0_i32_1 : i32, i32, i32
  }
  func.func @transform_3(%arg0: i32) -> (i32, i32, i32) {
    %c0_i32 = arith.constant 0 : i32
    %c0_i32_0 = arith.constant 0 : i32
    %c0_i32_1 = arith.constant 0 : i32
    %c0_i32_2 = arith.constant 0 : i32
    return %c0_i32, %c0_i32_0, %c0_i32_1 : i32, i32, i32
  }
  func.func @transform_4(%arg0: i32) -> (i32, i32, i32) {
    %c0_i32 = arith.constant 0 : i32
    %c0_i32_0 = arith.constant 0 : i32
    %c0_i32_1 = arith.constant 0 : i32
    %c0_i32_2 = arith.constant 0 : i32
    return %c0_i32, %c0_i32_0, %c0_i32_1 : i32, i32, i32
  }
  func.func @transform_5(%arg0: i32) -> (i32, i32) {
    %c0_i32 = arith.constant 0 : i32
    %c0_i32_0 = arith.constant 0 : i32
    %c0_i32_1 = arith.constant 0 : i32
    return %c0_i32, %c0_i32_0 : i32, i32
  }
  func.func @transform_6(%arg0: i32) -> (i32, i32) {
    %c0_i32 = arith.constant 0 : i32
    %c0_i32_0 = arith.constant 0 : i32
    %c0_i32_1 = arith.constant 0 : i32
    return %c0_i32, %c0_i32_0 : i32, i32
  }
  func.func @transform_7(%arg0: i32) -> (i32, i32) {
    %c0_i32 = arith.constant 0 : i32
    %c0_i32_0 = arith.constant 0 : i32
    %c0_i32_1 = arith.constant 0 : i32
    return %c0_i32, %c0_i32_0 : i32, i32
  }
  func.func @transform_8(%arg0: i32) -> (i32, i32) {
    %c0_i32 = arith.constant 0 : i32
    %c0_i32_0 = arith.constant 0 : i32
    return %arg0, %c0_i32 : i32, i32
  }
}

</mosaic_0001>

<bundles_post_ra>
// kernel: tpu_custom_call.1
= control target key start
LH: loop header
LB: loop body
LE: loop exit
PB: predicated region body
PF: predicated region fallthrough
CT: control target
= control target key end

     0   :  { %s3771_s27 = smov 0   ;;  %s5065_s0 = inlined_call_operand.vmem [shape: f32[32,16], index: 0, kind: input, shape index: {}]   ;;  %s5066_s1 = inlined_call_operand.vmem [shape: f32[2,16,32], index: 1, kind: input, shape index: {}]   ;;  %s5067_s2 = inlined_call_operand.vmem [shape: f32[2,256,32], index: 2, kind: input, shape index: {}]   ;;  %s5068_s3 = inlined_call_operand.vmem [shape: f32[2,128,32], index: 3, kind: input, shape index: {}]   ;;  %s5069_s4 = inlined_call_operand.vmem [shape: f32[8,32,32], index: 4, kind: input, shape index: {}]   ;;  %s5070_s5 = inlined_call_operand.vmem [shape: f32[6,32], index: 5, kind: input, shape index: {}]   ;;  %s5071_s6 = inlined_call_operand.vmem [shape: f32[8,32], index: 6, kind: input, shape index: {}]   ;;  %s5072_s7 = inlined_call_operand.vmem [shape: f32[1,8], index: 7, kind: input, shape index: {}]   ;;  %s5073_s8 = inlined_call_operand.vmem [shape: f32[32,8], index: 8, kind: output, shape index: {}]  }
   0x1 LB: > { %s3134_s28 = sadd.s32 4294967295, %s3722_s27   ;;  %p3138_p0 = scmp.ge.s32.totalorder %s3722_s27, 1  ;;  %s3722_s27 = sphi %s3771_s27, %s18_s27  }
   0x2   : > { %p263_p1 = scmp.lt.s32.totalorder %s3722_s27, 3 }
   0x4   : > { %p264_p2 = pnand %p3138_p0, %p263_p1 }
   0x5   : > { %s3139_s29 = sshll.u32 (!%p264_p2), %s3134_s28, 1  ;;  %v5074_v0 = vlaneseq (!%p264_p2)  ;;  %v622_v1 = vld [vmem:[%s5069_s4] sm:$0xff] (!%p264_p2)  ;;  %v623_v2 = vld [vmem:[%s5069_s4 + $0x8] sm:$0xff] (!%p264_p2)  ;;  %v624_v5 = vld [vmem:[%s5069_s4 + $0x10] sm:$0xff] (!%p264_p2)  ;;  %vm631_vm0 = vcmask (!%p264_p2), 261120   ;;  %vm1612_vm1 = vcmask (!%p264_p2), 1041409  }
   0x6   : > { %267 = sbr.rel (%p264_p2) target bundleno = 2377 (0x949), region = 52  ;;  %p298_p3 = scmp.lt.s32.totalorder (!%p264_p2), %s3139_s29, 3  ;;  %v3635_v4 = vpack.c.bf16 (!%p264_p2), %v623_v2, %v622_v1  ;;  %v625_v6 = vld [vmem:[%s5069_s4 + $0x18] sm:$0xff] (!%p264_p2)  ;;  %v3177_v33 = vld [vmem:[%s5069_s4 + $0x20] sm:$0xff] (!%p264_p2)  ;;  %v3178_v34 = vld [vmem:[%s5069_s4 + $0x28] sm:$0xff] (!%p264_p2)  ;;  %vm1614_vm2 = vcmask (!%p264_p2), 1042434  }
   0x7   : > { %v3786_v3 = vshrl.u32 (!%p264_p2), %v5074_v0, 7  ;;  %v3639_v7 = vpack.c.bf16 (!%p264_p2), %v625_v6, %v624_v5  ;;  %v3643_v36 = vpack.c.bf16 (!%p264_p2), %v3178_v34, %v3177_v33  ;;  %v3847_v37 = vld [vmem:[%s5066_s1] sm:$0xff] (!%p264_p2)  ;;  %v3852_v39 = vld [vmem:[%s5066_s1 + $0x10] sm:$0xff] (!%p264_p2)  ;;  %v3859_v43 = vld [vmem:[%s5066_s1 + $0x8] sm:$0xff] (!%p264_p2)  ;;  %vm1616_vm3 = vcmask (!%p264_p2), 1043459  }
   0x8   : > { %3636 = vmatprep.subr.bf16.mxu0 (!%p264_p2), %v3635_v4  ;;  %v3867_v45 = vld [vmem:[%s5066_s1 + $0x18] sm:$0xff] (!%p264_p2)  ;;  %vm1618_vm4 = vcmask (!%p264_p2), 1044484   ;;  %vm1620_vm5 = vcmask (!%p264_p2), 1045509   ;;  %vm1622_vm6 = vcmask (!%p264_p2), 1046534   ;;  %vm1624_vm7 = vcmask (!%p264_p2), 1047559  }
   0x9   : > { %v3797_v8 = vsub.s32 (!%p264_p2), 0, %v3786_v3  ;;  %v3800_v9 = vsub.s32 (!%p264_p2), 1, %v3786_v3  ;;  %3638 = vmatpush3.bf16.msra.mxu0 (!%p264_p2), %v3635_v4  ;;  %v3814_v13 = vsub.s32 (!%p264_p2), 2, %v3786_v3  ;;  %v3818_v15 = vsub.s32 (!%p264_p2), 3, %v3786_v3  ;;  %3699 = vmatprep.subr.bf16.mxu1 (!%p264_p2), %v3643_v36 }
   0xa   : > { %3640 = vmatprep.subr.bf16.mxu0 (!%p264_p2), %v3639_v7  ;;  %v3822_v17 = vsub.s32 (!%p264_p2), 4, %v3786_v3  ;;  %v3826_v19 = vsub.s32 (!%p264_p2), 5, %v3786_v3  ;;  %v385_v21 = vsub.s32 (!%p264_p2), 6, %v3786_v3  ;;  %v396_v23 = vsub.s32 (!%p264_p2), 7, %v3786_v3  ;;  %3701 = vmatpush3.bf16.msra.mxu1 (!%p264_p2), %v3643_v36 }
   0xb   : > { %vm3075_vm8 = vcmask (!%p264_p2), 64512  }
   0xd   : > { %s5083_s29 = smov (!%p298_p3, %s3139_s29), 3  ;;  %3642 = vmatpush3.bf16.msra.mxu0 %v3639_v7 }
   0xe   : > { %s3140_s16 = sshll.u32 %s5083_s29, 3  ;;  %3644 = vmatprep.subr.bf16.mxu0 %v3643_v36 }
   0xf   : > { %s3808_s19 = scalar_lea.vmem %s5065_s0, %s3140_s16  ;;  %s307_s20 = scalar_lea.vmem %s5073_s8, %s3140_s16 }
  0x10   : > { %v310_v10 = vld [vmem:[%s3808_s19] sm:$0xff]  ;;  %v311_v25 = vld [vmem:[%s3808_s19 + $0x8] sm:$0xff] }
  0x11   : > { %v320_v11 = vrot.slane %v310_v10, %v3797_v8  ;;  %v331_v12 = vrot.slane %v310_v10, %v3800_v9  ;;  %v342_v14 = vrot.slane %v310_v10, %v3814_v13  ;;  %v353_v16 = vrot.slane %v310_v10, %v3818_v15 }
  0x12   : > { %v364_v18 = vrot.slane %v310_v10, %v3822_v17  ;;  %v375_v20 = vrot.slane %v310_v10, %v3826_v19  ;;  %v386_v22 = vrot.slane %v310_v10, %v385_v21  ;;  %v397_v24 = vrot.slane %v310_v10, %v396_v23 }
  0x13   : > { %322 = vbcast.lane.b32.xlu0 %v320_v11, 256  ;;  %333 = vbcast.lane.b32.xlu1 %v331_v12, 256  ;;  %v408_v26 = vrot.slane %v311_v25, %v3797_v8  ;;  %v419_v27 = vrot.slane %v311_v25, %v3800_v9  ;;  %v430_v28 = vrot.slane %v311_v25, %v3814_v13 }
  0x14   : > { %v441_v29 = vrot.slane %v311_v25, %v3818_v15  ;;  %v452_v30 = vrot.slane %v311_v25, %v3822_v17  ;;  %v463_v31 = vrot.slane %v311_v25, %v3826_v19  ;;  %v474_v32 = vrot.slane %v311_v25, %v385_v21 }
  0x15   : > { %v485_v35 = vrot.slane %v311_v25, %v396_v23 }
  0x17   : > { %326 = vbcast.lane.b32.xlu0 %v320_v11, 264  ;;  %337 = vbcast.lane.b32.xlu1 %v331_v12, 264 }
  0x1b   : > { %344 = vbcast.lane.b32.xlu0 %v342_v14, 256  ;;  %348 = vbcast.lane.b32.xlu1 %v342_v14, 264 }
  0x1f   : > { %355 = vbcast.lane.b32.xlu0 %v353_v16, 256  ;;  %359 = vbcast.lane.b32.xlu1 %v353_v16, 264 }
  0x23   : > { %366 = vbcast.lane.b32.xlu0 %v364_v18, 256  ;;  %370 = vbcast.lane.b32.xlu1 %v364_v18, 264 }
  0x27   : > { %377 = vbcast.lane.b32.xlu0 %v375_v20, 256  ;;  %381 = vbcast.lane.b32.xlu1 %v375_v20, 264 }
  0x2b   : > { %388 = vbcast.lane.b32.xlu0 %v386_v22, 256  ;;  %392 = vbcast.lane.b32.xlu1 %v386_v22, 264 }
  0x2f   : > { %399 = vbcast.lane.b32.xlu0 %v397_v24, 256  ;;  %403 = vbcast.lane.b32.xlu1 %v397_v24, 264 }
  0x33   : > { %410 = vbcast.lane.b32.xlu0 %v408_v26, 256  ;;  %414 = vbcast.lane.b32.xlu1 %v408_v26, 264 }
  0x37   : > { %421 = vbcast.lane.b32.xlu0 %v419_v27, 256  ;;  %425 = vbcast.lane.b32.xlu1 %v419_v27, 264 }
  0x3b   : > { %432 = vbcast.lane.b32.xlu0 %v430_v28, 256  ;;  %436 = vbcast.lane.b32.xlu1 %v430_v28, 264 }
  0x3f   : > { %443 = vbcast.lane.b32.xlu0 %v441_v29, 256  ;;  %447 = vbcast.lane.b32.xlu1 %v441_v29, 264 }
  0x43   : > { %454 = vbcast.lane.b32.xlu0 %v452_v30, 256  ;;  %458 = vbcast.lane.b32.xlu1 %v452_v30, 264 }
  0x47   : > { %465 = vbcast.lane.b32.xlu0 %v463_v31, 256  ;;  %469 = vbcast.lane.b32.xlu1 %v463_v31, 264 }
  0x4b   : > { %476 = vbcast.lane.b32.xlu0 %v474_v32, 256  ;;  %480 = vbcast.lane.b32.xlu1 %v474_v32, 264 }
  0x4f   : > { %487 = vbcast.lane.b32.xlu0 %v485_v35, 256  ;;  %491 = vbcast.lane.b32.xlu1 %v485_v35, 264 }
  0x85   : > { %v323_v38 = vpop.permute.xlu0 %322  ;;  %v334_v40 = vpop.permute.xlu1 %333 }
  0x86   : > { %v493_v41 = vmul.f32 %v323_v38, %v3847_v37  ;;  %v495_v42 = vmul.f32 %v334_v40, %v3847_v37 }
  0x88   : > { %v3862_v44 = vadd.f32 %v3852_v39, %v493_v41  ;;  %v3874_v50 = vadd.f32 %v3852_v39, %v495_v42 }
  0x89   : > { %v327_v46 = vpop.permute.xlu0 %326  ;;  %v338_v47 = vpop.permute.xlu1 %337 }
  0x8a   : > { %v494_v48 = vmul.f32 %v327_v46, %v3859_v43  ;;  %3444 = vmatprep.mubr.msk.f32.mxu0 %vm631_vm0, %v3862_v44  ;;  %v496_v49 = vmul.f32 %v338_v47, %v3859_v43 }
  0x8c   : > { %v3877_v51 = vadd.f32 %v3867_v45, %v494_v48  ;;  %v3880_v54 = vadd.f32 %v3867_v45, %v496_v49 }
  0x8d   : > { %v345_v52 = vpop.permute.xlu0 %344  ;;  %v349_v53 = vpop.permute.xlu1 %348 }
  0x8e   : > { %3445 = vmatmul.mubr.msk.f32.vlgmr.msra.gmra.mrb[0].mxu0 %vm631_vm0, %v3877_v51  ;;  %v497_v55 = vmul.f32 %v345_v52, %v3847_v37  ;;  %v498_v56 = vmul.f32 %v349_v53, %v3859_v43 }
  0x8f   : > { %3447 = vmatprep.mubr.msk.f32.mxu0 %vm631_vm0, %v3874_v50  ;;  %3646 = vmatpush3.bf16.msra.mxu0 %v3643_v36 }
  0x90   : > { %v3889_v57 = vadd.f32 %v3852_v39, %v497_v55  ;;  %v3892_v60 = vadd.f32 %v3867_v45, %v498_v56 }
  0x91   : > { %v356_v58 = vpop.permute.xlu0 %355  ;;  %v360_v59 = vpop.permute.xlu1 %359 }
  0x92   : > { %3448 = vmatmul.mubr.msk.f32.gmra.mrb[2].mxu0 %vm631_vm0, %v3880_v54  ;;  %v499_v61 = vmul.f32 %v356_v58, %v3847_v37  ;;  %v500_v62 = vmul.f32 %v360_v59, %v3859_v43 }
  0x93   : > { %3450 = vmatprep.mubr.msk.f32.mxu0 %vm631_vm0, %v3889_v57 }
  0x94   : > { %v3901_v63 = vadd.f32 %v3852_v39, %v499_v61  ;;  %v3904_v4 = vadd.f32 %v3867_v45, %v500_v62 }
  0x95   : > { %v367_v1 = vpop.permute.xlu0 %366  ;;  %v371_v2 = vpop.permute.xlu1 %370 }
  0x96   : > { %3451 = vmatmul.mubr.msk.f32.gmra.mrb[4].mxu0 %vm631_vm0, %v3892_v60  ;;  %v501_v5 = vmul.f32 %v367_v1, %v3847_v37  ;;  %v502_v6 = vmul.f32 %v371_v2, %v3859_v43 }
  0x97   : > { %3453 = vmatprep.mubr.msk.f32.mxu0 %vm631_vm0, %v3901_v63 }
  0x98   : > { %v3913_v7 = vadd.f32 %v3852_v39, %v501_v5  ;;  %v3916_v12 = vadd.f32 %v3867_v45, %v502_v6 }
  0x99   : > { %v378_v10 = vpop.permute.xlu0 %377  ;;  %v382_v11 = vpop.permute.xlu1 %381 }
  0x9a   : > { %3454 = vmatmul.mubr.msk.f32.gmra.mrb[6].mxu0 %vm631_vm0, %v3904_v4  ;;  %v503_v14 = vmul.f32 %v378_v10, %v3847_v37  ;;  %v504_v16 = vmul.f32 %v382_v11, %v3859_v43 }
  0x9b   : > { %3456 = vmatprep.mubr.msk.f32.mxu0 %vm631_vm0, %v3913_v7 }
  0x9c   : > { %v3925_v18 = vadd.f32 %v3852_v39, %v503_v14  ;;  %v3928_v22 = vadd.f32 %v3867_v45, %v504_v16 }
  0x9d   : > { %v389_v20 = vpop.permute.xlu0 %388  ;;  %v393_v21 = vpop.permute.xlu1 %392 }
  0x9e   : > { %3457 = vmatmul.mubr.msk.f32.gmra.mrb[8].mxu0 %vm631_vm0, %v3916_v12  ;;  %v505_v23 = vmul.f32 %v389_v20, %v3847_v37  ;;  %v506_v24 = vmul.f32 %v393_v21, %v3859_v43 }
  0x9f   : > { %3459 = vmatprep.mubr.msk.f32.mxu0 %vm631_vm0, %v3925_v18 }
  0xa0   : > { %v3937_v25 = vadd.f32 %v3852_v39, %v505_v23  ;;  %v3940_v28 = vadd.f32 %v3867_v45, %v506_v24 }
  0xa1   : > { %v400_v26 = vpop.permute.xlu0 %399  ;;  %v404_v27 = vpop.permute.xlu1 %403 }
  0xa2   : > { %3460 = vmatmul.mubr.msk.f32.gmra.mrb[10].mxu0 %vm631_vm0, %v3928_v22  ;;  %v507_v29 = vmul.f32 %v400_v26, %v3847_v37  ;;  %v508_v30 = vmul.f32 %v404_v27, %v3859_v43 }
  0xa3   : > { %3462 = vmatprep.mubr.msk.f32.mxu0 %vm631_vm0, %v3937_v25 }
  0xa4   : > { %v3949_v31 = vadd.f32 %v3852_v39, %v507_v29  ;;  %v3952_v34 = vadd.f32 %v3867_v45, %v508_v30 }
  0xa5   : > { %v411_v32 = vpop.permute.xlu0 %410  ;;  %v415_v33 = vpop.permute.xlu1 %414 }
  0xa6   : > { %3463 = vmatmul.mubr.msk.f32.gmra.mrb[12].mxu0 %vm631_vm0, %v3940_v28  ;;  %v509_v35 = vmul.f32 %v411_v32, %v3847_v37  ;;  %v510_v36 = vmul.f32 %v415_v33, %v3859_v43 }
  0xa7   : > { %3465 = vmatprep.mubr.msk.f32.mxu0 %vm631_vm0, %v3949_v31 }
  0xa8   : > { %v3961_v38 = vadd.f32 %v3852_v39, %v509_v35  ;;  %v3964_v42 = vadd.f32 %v3867_v45, %v510_v36 }
  0xa9   : > { %v422_v40 = vpop.permute.xlu0 %421  ;;  %v426_v41 = vpop.permute.xlu1 %425 }
  0xaa   : > { %3466 = vmatmul.mubr.msk.f32.gmra.mrb[14].mxu0 %vm631_vm0, %v3952_v34  ;;  %v511_v46 = vmul.f32 %v422_v40, %v3847_v37  ;;  %v512_v47 = vmul.f32 %v426_v41, %v3859_v43 }
  0xab   : > { %3468 = vmatprep.mubr.msk.f32.mxu0 %vm631_vm0, %v3961_v38 }
  0xac   : > { %v3973_v48 = vadd.f32 %v3852_v39, %v511_v46  ;;  %v3976_v53 = vadd.f32 %v3867_v45, %v512_v47 }
  0xad   : > { %v433_v49 = vpop.permute.xlu0 %432  ;;  %v437_v52 = vpop.permute.xlu1 %436 }
  0xae   : > { %3469 = vmatmul.mubr.msk.f32.gmra.mrb[16].mxu0 %vm631_vm0, %v3964_v42  ;;  %v513_v55 = vmul.f32 %v433_v49, %v3847_v37  ;;  %v514_v56 = vmul.f32 %v437_v52, %v3859_v43 }
  0xaf   : > { %3471 = vmatprep.mubr.msk.f32.mxu0 %vm631_vm0, %v3973_v48 }
  0xb0   : > { %v3985_v58 = vadd.f32 %v3852_v39, %v513_v55  ;;  %v3988_v62 = vadd.f32 %v3867_v45, %v514_v56 }
  0xb1   : > { %v444_v59 = vpop.permute.xlu0 %443  ;;  %v448_v61 = vpop.permute.xlu1 %447 }
  0xb2   : > { %3472 = vmatmul.mubr.msk.f32.gmra.mrb[18].mxu0 %vm631_vm0, %v3976_v53  ;;  %v515_v1 = vmul.f32 %v444_v59, %v3847_v37  ;;  %v516_v2 = vmul.f32 %v448_v61, %v3859_v43  ;;  %v557_v59 = vld [vmem:[%s5067_s2] sm:$0xff]  ;;  %v3146_v61 = vld [vmem:[%s5067_s2 + $0x108] sm:$0xff] }
  0xb3   : > { %3474 = vmatprep.mubr.msk.f32.mxu0 %vm631_vm0, %v3985_v58 }
  0xb4   : > { %v3997_v5 = vadd.f32 %v3852_v39, %v515_v1  ;;  %v4000_v11 = vadd.f32 %v3867_v45, %v516_v2 }
  0xb5   : > { %v455_v6 = vpop.permute.xlu0 %454  ;;  %v459_v10 = vpop.permute.xlu1 %458 }
  0xb6   : > { %3475 = vmatmul.mubr.msk.f32.gmra.mrb[20].mxu0 %vm631_vm0, %v3988_v62  ;;  %v517_v14 = vmul.f32 %v455_v6, %v3847_v37  ;;  %v518_v16 = vmul.f32 %v459_v10, %v3859_v43  ;;  %v3145_v6 = vld [vmem:[%s5067_s2 + $0x100] sm:$0xff] }
  0xb7   : > { %3477 = vmatprep.mubr.msk.f32.mxu0 %vm631_vm0, %v3997_v5 }
  0xb8   : > { %v4009_v20 = vadd.f32 %v3852_v39, %v517_v14  ;;  %v4012_v24 = vadd.f32 %v3867_v45, %v518_v16  ;;  %v560_v16 = vld [vmem:[%s5067_s2 + $0x18] sm:$0xff] }
  0xb9   : > { %v466_v21 = vpop.permute.xlu0 %465  ;;  %v470_v23 = vpop.permute.xlu1 %469 }
  0xba   : > { %3478 = vmatmul.mubr.msk.f32.gmra.mrb[22].mxu0 %vm631_vm0, %v4000_v11  ;;  %v519_v26 = vmul.f32 %v466_v21, %v3847_v37  ;;  %v520_v27 = vmul.f32 %v470_v23, %v3859_v43  ;;  %v559_v23 = vld [vmem:[%s5067_s2 + $0x10] sm:$0xff] }
  0xbb   : > { %3480 = vmatprep.mubr.msk.f32.mxu0 %vm631_vm0, %v4009_v20 }
  0xbc   : > { %v4021_v29 = vadd.f32 %v3852_v39, %v519_v26  ;;  %v4024_v33 = vadd.f32 %v3867_v45, %v520_v27  ;;  %v3148_v27 = vld [vmem:[%s5067_s2 + $0x118] sm:$0xff] }
  0xbd   : > { %v477_v30 = vpop.permute.xlu0 %476  ;;  %v481_v32 = vpop.permute.xlu1 %480 }
  0xbe   : > { %3481 = vmatmul.mubr.msk.f32.gmra.mrb[24].mxu0 %vm631_vm0, %v4012_v24  ;;  %v521_v35 = vmul.f32 %v477_v30, %v3847_v37  ;;  %v522_v36 = vmul.f32 %v481_v32, %v3859_v43 }
  0xbf   : > { %3483 = vmatprep.mubr.msk.f32.mxu0 %vm631_vm0, %v4021_v29 }
  0xc0   : > { %v4033_v40 = vadd.f32 %v3852_v39, %v521_v35  ;;  %v4036_v47 = vadd.f32 %v3867_v45, %v522_v36  ;;  %v3147_v35 = vld [vmem:[%s5067_s2 + $0x110] sm:$0xff] }
  0xc1   : > { %v488_v41 = vpop.permute.xlu0 %487  ;;  %v492_v46 = vpop.permute.xlu1 %491 }
  0xc2   : > { %3484 = vmatmul.mubr.msk.f32.gmra.mrb[26].mxu0 %vm631_vm0, %v4024_v33  ;;  %v523_v49 = vmul.f32 %v488_v41, %v3847_v37  ;;  %v524_v52 = vmul.f32 %v492_v46, %v3859_v43  ;;  %v3179_v37 = vld [vmem:[%s5069_s4 + $0x30] sm:$0xff] }
  0xc3   : > { %3486 = vmatprep.mubr.msk.f32.mxu0 %vm631_vm0, %v4033_v40 }
  0xc4   : > { %v4045_v55 = vadd.f32 %v3852_v39, %v523_v49  ;;  %v4048_v56 = vadd.f32 %v3867_v45, %v524_v52  ;;  %v3180_v39 = vld [vmem:[%s5069_s4 + $0x38] sm:$0xff]  ;;  %v558_v45 = vld [vmem:[%s5067_s2 + $0x8] sm:$0xff] }
  0xc5   : > { %v3647_v43 = vpack.c.bf16 %v3180_v39, %v3179_v37  ;;  %v562_v49 = vld [vmem:[%s5067_s2 + $0x28] sm:$0xff]  ;;  %v561_v39 = vld [vmem:[%s5067_s2 + $0x20] sm:$0xff] }
  0xc6   : > { %3487 = vmatmul.mubr.msk.f32.gmra.mrb[28].mxu0 %vm631_vm0, %v4036_v47 }
  0xc7   : > { %3489 = vmatprep.mubr.msk.f32.mxu0 %vm631_vm0, %v4045_v55  ;;  %3648 = vmatprep.subr.bf16.mxu0 %v3647_v43 }
  0xc8   : > { %3700 = vmatprep.subr.bf16.mxu1 %v3647_v43  ;;  %3650 = vmatpush3.bf16.msra.mxu0 %v3647_v43 }
  0xc9   : > { %3702 = vmatpush3.bf16.msra.mxu1 %v3647_v43 }
  0xca   : > { %3490 = vmatmul.mubr.msk.f32.gmra.mrb[30].mxu0 %vm631_vm0, %v4048_v56 }
 0x161   : > { %v3446_v1 = vpop.f32.mrb[0].mxu0 }
 0x162   : > { %v954_v2 = vmul.f32 %v3446_v1, %v558_v45  ;;  %v794_v10 = vpop.f32.mrb[1].mxu0  ;;  %v3150_v45 = vld [vmem:[%s5067_s2 + $0x128] sm:$0xff]  ;;  %v3149_v1 = vld [vmem:[%s5067_s2 + $0x120] sm:$0xff] }
 0x163   : > { %v953_v14 = vmul.f32 %v794_v10, %v557_v59 }
 0x164   : > { %v986_v21 = vadd.f32 %v3146_v61, %v954_v2 }
 0x165   : > { %v985_v26 = vadd.f32 %v3145_v6, %v953_v14  ;;  %v3449_v30 = vpop.f32.mrb[2].mxu0  ;;  %v564_v14 = vld [vmem:[%s5067_s2 + $0x38] sm:$0xff] }
 0x166   : > { %v956_v32 = vmul.f32 %v3449_v30, %v560_v16  ;;  %v804_v36 = vpop.f32.mrb[3].mxu0  ;;  %v1018_v52 = vmax.f32 %v986_v21, 0.0 }
 0x167   : > { %v1017_v41 = vmax.f32 %v985_v26, 0.0  ;;  %v955_v46 = vmul.f32 %v804_v36, %v559_v23  ;;  %v563_v23 = vld [vmem:[%s5067_s2 + $0x30] sm:$0xff] }
 0x168   : > { %v988_v37 = vadd.f32 %v3148_v27, %v956_v32  ;;  %v3152_v27 = vld [vmem:[%s5067_s2 + $0x138] sm:$0xff]  ;;  %v3151_v36 = vld [vmem:[%s5067_s2 + $0x130] sm:$0xff] }
 0x169   : > { %v987_v43 = vadd.f32 %v3147_v35, %v955_v46  ;;  %v3452_v59 = vpop.f32.mrb[4].mxu0  ;;  %3500 = vmatprep.mubr.msk.f32.mxu0 %vm631_vm0, %v1017_v41 }
 0x16a   : > { %v958_v61 = vmul.f32 %v3452_v59, %v562_v49  ;;  %v814_v2 = vpop.f32.mrb[5].mxu0  ;;  %3501 = vmatmul.mubr.msk.f32.vlgmr.msra.gmra.mrb[32].mxu0 %vm631_vm0, %v1018_v52  ;;  %v1020_v16 = vmax.f32 %v988_v37, 0.0  ;;  %v566_v49 = vld [vmem:[%s5067_s2 + $0x48] sm:$0xff] }
 0x16b   : > { %v1019_v6 = vmax.f32 %v987_v43, 0.0  ;;  %v957_v10 = vmul.f32 %v814_v2, %v561_v39  ;;  %v565_v39 = vld [vmem:[%s5067_s2 + $0x40] sm:$0xff]  ;;  %v3154_v43 = vld [vmem:[%s5067_s2 + $0x148] sm:$0xff] }
 0x16c   : > { %v990_v21 = vadd.f32 %v3150_v45, %v958_v61 }
 0x16d   : > { %v989_v26 = vadd.f32 %v3149_v1, %v957_v10  ;;  %v3455_v30 = vpop.f32.mrb[6].mxu0  ;;  %3503 = vmatprep.mubr.msk.f32.mxu0 %vm631_vm0, %v1019_v6  ;;  %v3153_v1 = vld [vmem:[%s5067_s2 + $0x140] sm:$0xff]  ;;  %v568_v10 = vld [vmem:[%s5067_s2 + $0x58] sm:$0xff] }
 0x16e   : > { %v960_v32 = vmul.f32 %v3455_v30, %v564_v14  ;;  %v824_v35 = vpop.f32.mrb[7].mxu0  ;;  %3504 = vmatmul.mubr.msk.f32.gmra.mrb[34].mxu0 %vm631_vm0, %v1020_v16  ;;  %v1022_v52 = vmax.f32 %v990_v21, 0.0 }
 0x16f   : > { %v1021_v41 = vmax.f32 %v989_v26, 0.0  ;;  %v959_v46 = vmul.f32 %v824_v35, %v563_v23  ;;  %v567_v23 = vld [vmem:[%s5067_s2 + $0x50] sm:$0xff] }
 0x170   : > { %v992_v37 = vadd.f32 %v3152_v27, %v960_v32  ;;  %v3156_v27 = vld [vmem:[%s5067_s2 + $0x158] sm:$0xff]  ;;  %v3155_v35 = vld [vmem:[%s5067_s2 + $0x150] sm:$0xff] }
 0x171   : > { %v3458_v45 = vpop.f32.mrb[8].mxu0  ;;  %3506 = vmatprep.mubr.msk.f32.mxu0 %vm631_vm0, %v1021_v41  ;;  %v991_v59 = vadd.f32 %v3151_v36, %v959_v46 }
 0x172   : > { %v962_v61 = vmul.f32 %v3458_v45, %v566_v49  ;;  %v834_v2 = vpop.f32.mrb[9].mxu0  ;;  %3507 = vmatmul.mubr.msk.f32.gmra.mrb[36].mxu0 %vm631_vm0, %v1022_v52  ;;  %v1024_v16 = vmax.f32 %v992_v37, 0.0  ;;  %v570_v49 = vld [vmem:[%s5067_s2 + $0x68] sm:$0xff] }
 0x173   : > { %v961_v6 = vmul.f32 %v834_v2, %v565_v39  ;;  %v1023_v14 = vmax.f32 %v991_v59, 0.0  ;;  %v569_v39 = vld [vmem:[%s5067_s2 + $0x60] sm:$0xff]  ;;  %v3158_v45 = vld [vmem:[%s5067_s2 + $0x168] sm:$0xff] }
 0x174   : > { %v994_v21 = vadd.f32 %v3154_v43, %v962_v61 }
 0x175   : > { %v993_v26 = vadd.f32 %v3153_v1, %v961_v6  ;;  %v3461_v30 = vpop.f32.mrb[10].mxu0  ;;  %3509 = vmatprep.mubr.msk.f32.mxu1 %vm631_vm0, %v1023_v14  ;;  %v3157_v1 = vld [vmem:[%s5067_s2 + $0x160] sm:$0xff]  ;;  %v572_v14 = vld [vmem:[%s5067_s2 + $0x78] sm:$0xff] }
 0x176   : > { %v964_v32 = vmul.f32 %v3461_v30, %v568_v10  ;;  %v844_v36 = vpop.f32.mrb[11].mxu0  ;;  %3510 = vmatmul.mubr.msk.f32.vlgmr.msra.gmra.mrb[0].mxu1 %vm631_vm0, %v1024_v16  ;;  %v1026_v52 = vmax.f32 %v994_v21, 0.0 }
 0x177   : > { %v1025_v41 = vmax.f32 %v993_v26, 0.0  ;;  %v963_v46 = vmul.f32 %v844_v36, %v567_v23  ;;  %v571_v23 = vld [vmem:[%s5067_s2 + $0x70] sm:$0xff] }
 0x178   : > { %v996_v37 = vadd.f32 %v3156_v27, %v964_v32  ;;  %v3160_v27 = vld [vmem:[%s5067_s2 + $0x178] sm:$0xff] }
 0x179   : > { %v995_v43 = vadd.f32 %v3155_v35, %v963_v46  ;;  %v3464_v59 = vpop.f32.mrb[12].mxu0  ;;  %3512 = vmatprep.mubr.msk.f32.mxu1 %vm631_vm0, %v1025_v41  ;;  %v3159_v35 = vld [vmem:[%s5067_s2 + $0x170] sm:$0xff] }
 0x17a   : > { %v966_v61 = vmul.f32 %v3464_v59, %v570_v49  ;;  %v854_v2 = vpop.f32.mrb[13].mxu0  ;;  %3513 = vmatmul.mubr.msk.f32.gmra.mrb[2].mxu1 %vm631_vm0, %v1026_v52  ;;  %v1028_v16 = vmax.f32 %v996_v37, 0.0  ;;  %v574_v49 = vld [vmem:[%s5067_s2 + $0x88] sm:$0xff] }
 0x17b   : > { %v1027_v6 = vmax.f32 %v995_v43, 0.0  ;;  %v965_v10 = vmul.f32 %v854_v2, %v569_v39  ;;  %v573_v39 = vld [vmem:[%s5067_s2 + $0x80] sm:$0xff] }
 0x17c   : > { %v998_v21 = vadd.f32 %v3158_v45, %v966_v61  ;;  %v3162_v45 = vld [vmem:[%s5067_s2 + $0x188] sm:$0xff] }
 0x17d   : > { %v997_v26 = vadd.f32 %v3157_v1, %v965_v10  ;;  %v3467_v30 = vpop.f32.mrb[14].mxu0  ;;  %3515 = vmatprep.mubr.msk.f32.mxu1 %vm631_vm0, %v1027_v6  ;;  %v3161_v1 = vld [vmem:[%s5067_s2 + $0x180] sm:$0xff] }
 0x17e   : > { %v968_v32 = vmul.f32 %v3467_v30, %v572_v14  ;;  %v864_v36 = vpop.f32.mrb[15].mxu0  ;;  %3516 = vmatmul.mubr.msk.f32.gmra.mrb[4].mxu1 %vm631_vm0, %v1028_v16  ;;  %v1030_v52 = vmax.f32 %v998_v21, 0.0  ;;  %v576_v14 = vld [vmem:[%s5067_s2 + $0x98] sm:$0xff] }
 0x17f   : > { %v1029_v41 = vmax.f32 %v997_v26, 0.0  ;;  %v967_v46 = vmul.f32 %v864_v36, %v571_v23  ;;  %v575_v23 = vld [vmem:[%s5067_s2 + $0x90] sm:$0xff] }
 0x180   : > { %v1000_v37 = vadd.f32 %v3160_v27, %v968_v32  ;;  %v3164_v27 = vld [vmem:[%s5067_s2 + $0x198] sm:$0xff] }
 0x181   : > { %v999_v43 = vadd.f32 %v3159_v35, %v967_v46  ;;  %v3470_v59 = vpop.f32.mrb[16].mxu0  ;;  %3518 = vmatprep.mubr.msk.f32.mxu1 %vm631_vm0, %v1029_v41  ;;  %v3163_v35 = vld [vmem:[%s5067_s2 + $0x190] sm:$0xff] }
 0x182   : > { %v970_v61 = vmul.f32 %v3470_v59, %v574_v49  ;;  %v874_v2 = vpop.f32.mrb[17].mxu0  ;;  %3519 = vmatmul.mubr.msk.f32.gmra.mrb[6].mxu1 %vm631_vm0, %v1030_v52  ;;  %v1032_v16 = vmax.f32 %v1000_v37, 0.0  ;;  %v578_v49 = vld [vmem:[%s5067_s2 + $0xa8] sm:$0xff] }
 0x183   : > { %v1031_v6 = vmax.f32 %v999_v43, 0.0  ;;  %v969_v10 = vmul.f32 %v874_v2, %v573_v39  ;;  %v577_v39 = vld [vmem:[%s5067_s2 + $0xa0] sm:$0xff] }
 0x184   : > { %v1002_v21 = vadd.f32 %v3162_v45, %v970_v61  ;;  %v3166_v45 = vld [vmem:[%s5067_s2 + $0x1a8] sm:$0xff] }
 0x185   : > { %v1001_v26 = vadd.f32 %v3161_v1, %v969_v10  ;;  %v3473_v30 = vpop.f32.mrb[18].mxu0  ;;  %3521 = vmatprep.mubr.msk.f32.mxu1 %vm631_vm0, %v1031_v6  ;;  %v3165_v1 = vld [vmem:[%s5067_s2 + $0x1a0] sm:$0xff] }
 0x186   : > { %v972_v32 = vmul.f32 %v3473_v30, %v576_v14  ;;  %v884_v36 = vpop.f32.mrb[19].mxu0  ;;  %3522 = vmatmul.mubr.msk.f32.gmra.mrb[8].mxu1 %vm631_vm0, %v1032_v16  ;;  %v1034_v52 = vmax.f32 %v1002_v21, 0.0  ;;  %v580_v14 = vld [vmem:[%s5067_s2 + $0xb8] sm:$0xff] }
 0x187   : > { %v1033_v41 = vmax.f32 %v1001_v26, 0.0  ;;  %v971_v46 = vmul.f32 %v884_v36, %v575_v23  ;;  %v579_v23 = vld [vmem:[%s5067_s2 + $0xb0] sm:$0xff] }
 0x188   : > { %v1004_v37 = vadd.f32 %v3164_v27, %v972_v32  ;;  %v3168_v27 = vld [vmem:[%s5067_s2 + $0x1b8] sm:$0xff] }
 0x189   : > { %v1003_v43 = vadd.f32 %v3163_v35, %v971_v46  ;;  %v3476_v59 = vpop.f32.mrb[20].mxu0  ;;  %3524 = vmatprep.mubr.msk.f32.mxu1 %vm631_vm0, %v1033_v41  ;;  %v3167_v35 = vld [vmem:[%s5067_s2 + $0x1b0] sm:$0xff] }
 0x18a   : > { %v974_v61 = vmul.f32 %v3476_v59, %v578_v49  ;;  %v894_v2 = vpop.f32.mrb[21].mxu0  ;;  %3525 = vmatmul.mubr.msk.f32.gmra.mrb[10].mxu1 %vm631_vm0, %v1034_v52  ;;  %v1036_v16 = vmax.f32 %v1004_v37, 0.0  ;;  %v582_v49 = vld [vmem:[%s5067_s2 + $0xc8] sm:$0xff] }
 0x18b   : > { %v1035_v6 = vmax.f32 %v1003_v43, 0.0  ;;  %v973_v10 = vmul.f32 %v894_v2, %v577_v39  ;;  %v581_v39 = vld [vmem:[%s5067_s2 + $0xc0] sm:$0xff] }
 0x18c   : > { %v1006_v21 = vadd.f32 %v3166_v45, %v974_v61  ;;  %v3170_v45 = vld [vmem:[%s5067_s2 + $0x1c8] sm:$0xff] }
 0x18d   : > { %v1005_v26 = vadd.f32 %v3165_v1, %v973_v10  ;;  %v3479_v30 = vpop.f32.mrb[22].mxu0  ;;  %3527 = vmatprep.mubr.msk.f32.mxu1 %vm631_vm0, %v1035_v6  ;;  %v3169_v1 = vld [vmem:[%s5067_s2 + $0x1c0] sm:$0xff] }
 0x18e   : > { %v976_v32 = vmul.f32 %v3479_v30, %v580_v14  ;;  %v904_v36 = vpop.f32.mrb[23].mxu0  ;;  %3528 = vmatmul.mubr.msk.f32.gmra.mrb[12].mxu1 %vm631_vm0, %v1036_v16  ;;  %v1038_v52 = vmax.f32 %v1006_v21, 0.0  ;;  %v584_v14 = vld [vmem:[%s5067_s2 + $0xd8] sm:$0xff] }
 0x18f   : > { %v1037_v41 = vmax.f32 %v1005_v26, 0.0  ;;  %v975_v46 = vmul.f32 %v904_v36, %v579_v23  ;;  %v583_v23 = vld [vmem:[%s5067_s2 + $0xd0] sm:$0xff] }
 0x190   : > { %v1008_v37 = vadd.f32 %v3168_v27, %v976_v32  ;;  %v3172_v27 = vld [vmem:[%s5067_s2 + $0x1d8] sm:$0xff] }
 0x191   : > { %v1007_v43 = vadd.f32 %v3167_v35, %v975_v46  ;;  %v3482_v59 = vpop.f32.mrb[24].mxu0  ;;  %3530 = vmatprep.mubr.msk.f32.mxu1 %vm631_vm0, %v1037_v41  ;;  %v3171_v35 = vld [vmem:[%s5067_s2 + $0x1d0] sm:$0xff] }
 0x192   : > { %v978_v61 = vmul.f32 %v3482_v59, %v582_v49  ;;  %v914_v2 = vpop.f32.mrb[25].mxu0  ;;  %3531 = vmatmul.mubr.msk.f32.gmra.mrb[14].mxu1 %vm631_vm0, %v1038_v52  ;;  %v1040_v16 = vmax.f32 %v1008_v37, 0.0  ;;  %v586_v49 = vld [vmem:[%s5067_s2 + $0xe8] sm:$0xff] }
 0x193   : > { %v1039_v6 = vmax.f32 %v1007_v43, 0.0  ;;  %v977_v10 = vmul.f32 %v914_v2, %v581_v39  ;;  %v585_v39 = vld [vmem:[%s5067_s2 + $0xe0] sm:$0xff] }
 0x194   : > { %v1010_v21 = vadd.f32 %v3170_v45, %v978_v61  ;;  %v3174_v45 = vld [vmem:[%s5067_s2 + $0x1e8] sm:$0xff] }
 0x195   : > { %v1009_v26 = vadd.f32 %v3169_v1, %v977_v10  ;;  %v3485_v30 = vpop.f32.mrb[26].mxu0  ;;  %3533 = vmatprep.mubr.msk.f32.mxu1 %vm631_vm0, %v1039_v6  ;;  %v3173_v1 = vld [vmem:[%s5067_s2 + $0x1e0] sm:$0xff] }
 0x196   : > { %v980_v32 = vmul.f32 %v3485_v30, %v584_v14  ;;  %v924_v36 = vpop.f32.mrb[27].mxu0  ;;  %3534 = vmatmul.mubr.msk.f32.gmra.mrb[16].mxu1 %vm631_vm0, %v1040_v16  ;;  %v1042_v52 = vmax.f32 %v1010_v21, 0.0  ;;  %v588_v14 = vld [vmem:[%s5067_s2 + $0xf8] sm:$0xff] }
 0x197   : > { %v1041_v41 = vmax.f32 %v1009_v26, 0.0  ;;  %v979_v46 = vmul.f32 %v924_v36, %v583_v23  ;;  %v587_v23 = vld [vmem:[%s5067_s2 + $0xf0] sm:$0xff] }
 0x198   : > { %v1012_v37 = vadd.f32 %v3172_v27, %v980_v32  ;;  %v3176_v27 = vld [vmem:[%s5067_s2 + $0x1f8] sm:$0xff] }
 0x199   : > { %v1011_v43 = vadd.f32 %v3171_v35, %v979_v46  ;;  %v3488_v59 = vpop.f32.mrb[28].mxu0  ;;  %3536 = vmatprep.mubr.msk.f32.mxu1 %vm631_vm0, %v1041_v41  ;;  %v3175_v35 = vld [vmem:[%s5067_s2 + $0x1f0] sm:$0xff] }
 0x19a   : > { %v982_v61 = vmul.f32 %v3488_v59, %v586_v49  ;;  %v934_v2 = vpop.f32.mrb[29].mxu0  ;;  %3537 = vmatmul.mubr.msk.f32.gmra.mrb[18].mxu1 %vm631_vm0, %v1042_v52  ;;  %v1044_v16 = vmax.f32 %v1012_v37, 0.0  ;;  %v3246_v59 = vld [vmem:[%s5069_s4 + $0x48] sm:$0xff] }
 0x19b   : > { %v1043_v6 = vmax.f32 %v1011_v43, 0.0  ;;  %v981_v10 = vmul.f32 %v934_v2, %v585_v39  ;;  %v3248_v2 = vld [vmem:[%s5069_s4 + $0x58] sm:$0xff] }
 0x19c   : > { %v1014_v21 = vadd.f32 %v3174_v45, %v982_v61  ;;  %v3245_v45 = vld [vmem:[%s5069_s4 + $0x40] sm:$0xff] }
 0x19d   : > { %v1013_v26 = vadd.f32 %v3173_v1, %v981_v10  ;;  %v3491_v30 = vpop.f32.mrb[30].mxu0  ;;  %3539 = vmatprep.mubr.msk.f32.mxu1 %vm631_vm0, %v1043_v6  ;;  %v3651_v61 = vpack.c.bf16 %v3246_v59, %v3245_v45  ;;  %v3247_v1 = vld [vmem:[%s5069_s4 + $0x50] sm:$0xff]  ;;  %v3249_v10 = vld [vmem:[%s5069_s4 + $0x60] sm:$0xff] }
 0x19e   : > { %v984_v32 = vmul.f32 %v3491_v30, %v588_v14  ;;  %v944_v36 = vpop.f32.mrb[31].mxu0  ;;  %3540 = vmatmul.mubr.msk.f32.gmra.mrb[20].mxu1 %vm631_vm0, %v1044_v16  ;;  %v1046_v49 = vmax.f32 %v1014_v21, 0.0  ;;  %v3655_v6 = vpack.c.bf16 %v3248_v2, %v3247_v1  ;;  %v3250_v14 = vld [vmem:[%s5069_s4 + $0x68] sm:$0xff]  ;;  %v3251_v16 = vld [vmem:[%s5069_s4 + $0x70] sm:$0xff] }
 0x19f   : > { %v1045_v41 = vmax.f32 %v1013_v26, 0.0  ;;  %v983_v46 = vmul.f32 %v944_v36, %v587_v23  ;;  %3652 = vmatprep.subr.bf16.mxu0 %v3651_v61  ;;  %v3659_v21 = vpack.c.bf16 %v3250_v14, %v3249_v10  ;;  %v3252_v23 = vld [vmem:[%s5069_s4 + $0x78] sm:$0xff] }
 0x1a0   : > { %v1016_v52 = vadd.f32 %v3176_v27, %v984_v32  ;;  %3654 = vmatpush3.bf16.msra.mxu0 %v3651_v61  ;;  %v3663_v26 = vpack.c.bf16 %v3252_v23, %v3251_v16  ;;  %v4313_v27 = vld [vmem:[%s5070_s5] sm:$0x3f] }
 0x1a1   : > { %v1015_v37 = vadd.f32 %v3175_v35, %v983_v46  ;;  %3542 = vmatprep.mubr.msk.f32.mxu1 %vm631_vm0, %v1045_v41  ;;  %3656 = vmatprep.subr.bf16.mxu0 %v3655_v6  ;;  %v4317_v30 = vrot.slane %v4313_v27, %v3797_v8 }
 0x1a2   : > { %3543 = vmatmul.mubr.msk.f32.gmra.mrb[22].mxu1 %vm631_vm0, %v1046_v49  ;;  %v1048_v43 = vmax.f32 %v1016_v52, 0.0  ;;  %3660 = vmatprep.subr.bf16.mxu1 %v3659_v21 }
 0x1a3   : > { %v1047_v39 = vmax.f32 %v1015_v37, 0.0  ;;  %3662 = vmatpush3.bf16.msra.mxu1 %v3659_v21 }
 0x1a4   : > { %3658 = vmatpush3.bf16.msra.mxu0 %v3655_v6  ;;  %3664 = vmatprep.subr.bf16.mxu1 %v3663_v26 }
 0x1a5   : > { %3545 = vmatprep.mubr.msk.f32.mxu1 %vm631_vm0, %v1047_v39 }
 0x1a6   : > { %3546 = vmatmul.mubr.msk.f32.gmra.mrb[24].mxu1 %vm631_vm0, %v1048_v43 }
 0x1a7   : > { %3666 = vmatpush3.bf16.msra.mxu1 %v3663_v26 }
 0x23d   : > { %v3502_v32 = vpop.f32.mrb[32].mxu0 }
 0x23e   : > { %v1221_v35 = vadd.f32 %v3502_v32, %v4317_v30  ;;  %v1215_v36 = vpop.f32.mrb[33].mxu0 }
 0x23f   : > { %v1216_v41 = vadd.f32 %v1215_v36, %v4317_v30 }
 0x240   : > { %v1375_v46 = vadd.f32 %v1221_v35, %v3877_v51 }
 0x241   : > { %v1374_v49 = vadd.f32 %v1216_v41, %v3862_v44  ;;  %v3505_v52 = vpop.f32.mrb[34].mxu0 }
 0x242   : > { %v1407_v37 = vmax.f32 %v1375_v46, 0.0  ;;  %v1231_v39 = vadd.f32 %v3505_v52, %v4317_v30  ;;  %v1225_v43 = vpop.f32.mrb[35].mxu0 }
 0x243   : > { %v1406_v45 = vmax.f32 %v1374_v49, 0.0  ;;  %v1226_v59 = vadd.f32 %v1225_v43, %v4317_v30 }
 0x244   : > { %v1439_v61 = vsel %vm631_vm0, %v1407_v37, 0.0  ;;  %v1377_v1 = vadd.f32 %v1231_v39, %v3880_v54 }
 0x245   : > { %v1438_v2 = vsel %vm631_vm0, %v1406_v45, 0.0  ;;  %v1376_v6 = vadd.f32 %v1226_v59, %v3874_v50  ;;  %v3508_v10 = vpop.f32.mrb[36].mxu0 }
 0x246   : > { %v1440_v51 = vadd.f32 %v1439_v61, %v1438_v2  ;;  %v1409_v14 = vmax.f32 %v1377_v1, 0.0  ;;  %v1241_v44 = vadd.f32 %v3508_v10, %v4317_v30  ;;  %v1235_v16 = vpop.f32.mrb[37].mxu0 }
 0x247   : > { %v1408_v21 = vmax.f32 %v1376_v6, 0.0  ;;  %v1236_v23 = vadd.f32 %v1235_v16, %v4317_v30 }
 0x248   : > { %v1441_v26 = vrot.slane %v1440_v51, 4  ;;  %v1448_v32 = vsel %vm631_vm0, %v1409_v14, 0.0  ;;  %v1379_v35 = vadd.f32 %v1241_v44, %v3892_v60 }
 0x249   : > { %v1447_v54 = vsel %vm631_vm0, %v1408_v21, 0.0  ;;  %v1378_v36 = vadd.f32 %v1236_v23, %v3889_v57  ;;  %v3511_v41 = vpop.f32.mrb[0].mxu1 }
 0x24a   : > { %v1449_v50 = vadd.f32 %v1448_v32, %v1447_v54  ;;  %v1411_v46 = vmax.f32 %v1379_v35, 0.0  ;;  %v1251_v49 = vadd.f32 %v3511_v41, %v4317_v30  ;;  %v1245_v52 = vpop.f32.mrb[1].mxu1  ;;  %v1442_v43 = vadd.f32 %v1441_v26, %v1440_v51 }
 0x24b   : > { %v1410_v37 = vmax.f32 %v1378_v36, 0.0  ;;  %v1246_v39 = vadd.f32 %v1245_v52, %v4317_v30 }
 0x24c   : > { %v1450_v45 = vrot.slane %v1449_v50, 4  ;;  %v1457_v59 = vsel %vm631_vm0, %v1411_v46, 0.0  ;;  %v1381_v61 = vadd.f32 %v1251_v49, %v3904_v4  ;;  %v1443_v51 = vrot.slane %v1442_v43, 2 }
 0x24d   : > { %v1456_v60 = vsel %vm631_vm0, %v1410_v37, 0.0  ;;  %v1380_v1 = vadd.f32 %v1246_v39, %v3901_v63  ;;  %v3514_v57 = vpop.f32.mrb[2].mxu1 }
 0x24e   : > { %v1451_v2 = vadd.f32 %v1450_v45, %v1449_v50  ;;  %v1458_v6 = vadd.f32 %v1457_v59, %v1456_v60  ;;  %v1413_v10 = vmax.f32 %v1381_v61, 0.0  ;;  %v1255_v14 = vpop.f32.mrb[3].mxu1  ;;  %v1261_v16 = vadd.f32 %v3514_v57, %v4317_v30 }
 0x24f   : > { %v1412_v44 = vmax.f32 %v1380_v1, 0.0  ;;  %v1256_v21 = vadd.f32 %v1255_v14, %v4317_v30  ;;  %v1444_v45 = vadd.f32 %v1443_v51, %v1442_v43 }
 0x250   : > { %v1452_v23 = vrot.slane %v1451_v2, 2  ;;  %v1459_v26 = vrot.slane %v1458_v6, 4  ;;  %v1466_v32 = vsel %vm631_vm0, %v1413_v10, 0.0  ;;  %v1383_v35 = vadd.f32 %v1261_v16, %v3916_v12 }
 0x251   : > { %v1465_v4 = vsel %vm631_vm0, %v1412_v44, 0.0  ;;  %v1382_v63 = vadd.f32 %v1256_v21, %v3913_v7  ;;  %v3517_v54 = vpop.f32.mrb[4].mxu1  ;;  %v1445_v51 = vrot.slane %v1444_v45, 1 }
 0x252   : > { %v1453_v36 = vadd.f32 %v1452_v23, %v1451_v2  ;;  %v1460_v41 = vadd.f32 %v1459_v26, %v1458_v6  ;;  %v1467_v50 = vadd.f32 %v1466_v32, %v1465_v4  ;;  %v1265_v46 = vpop.f32.mrb[5].mxu1  ;;  %v1415_v49 = vmax.f32 %v1383_v35, 0.0 }
 0x253   : > { %v1414_v52 = vmax.f32 %v1382_v63, 0.0  ;;  %v1271_v37 = vadd.f32 %v3517_v54, %v4317_v30  ;;  %v1266_v39 = vadd.f32 %v1265_v46, %v4317_v30 }
 0x254   : > { %v1468_v59 = vrot.slane %v1467_v50, 4  ;;  %v1475_v61 = vsel %vm631_vm0, %v1415_v49, 0.0  ;;  %v1454_v57 = vrot.slane %v1453_v36, 1  ;;  %v1461_v2 = vrot.slane %v1460_v41, 2 }
 0x255   : > { %v1474_v60 = vsel %vm631_vm0, %v1414_v52, 0.0  ;;  %v1385_v12 = vadd.f32 %v1271_v37, %v3928_v22  ;;  %v1384_v7 = vadd.f32 %v1266_v39, %v3925_v18  ;;  %v3520_v1 = vpop.f32.mrb[6].mxu1 }
 0x256   : > { %v1469_v6 = vadd.f32 %v1468_v59, %v1467_v50  ;;  %v1476_v10 = vadd.f32 %v1475_v61, %v1474_v60  ;;  %v1275_v14 = vpop.f32.mrb[7].mxu1  ;;  %v1281_v21 = vadd.f32 %v3520_v1, %v4317_v30  ;;  %v4359_v63 = vadd.f32 %v1454_v57, %v1453_v36 }
 0x257   : > { %v1417_v44 = vmax.f32 %v1385_v12, 0.0  ;;  %v1416_v16 = vmax.f32 %v1384_v7, 0.0  ;;  %v1276_v43 = vadd.f32 %v1275_v14, %v4317_v30  ;;  %v1462_v54 = vadd.f32 %v1461_v2, %v1460_v41 }
 0x258   : > { %v1470_v23 = vrot.slane %v1469_v6, 2  ;;  %v1477_v26 = vrot.slane %v1476_v10, 4  ;;  %v1387_v32 = vadd.f32 %v1281_v21, %v3940_v28  ;;  %v4363_v61 = vadd.f32 %v1445_v51, %v1444_v45 }
 0x259   : > { %v1484_v22 = vsel %vm631_vm0, %v1417_v44, 0.0  ;;  %v1483_v18 = vsel %vm631_vm0, %v1416_v16, 0.0  ;;  %v1386_v4 = vadd.f32 %v1276_v43, %v3937_v25  ;;  %v3523_v35 = vpop.f32.mrb[8].mxu1  ;;  %v1463_v2 = vrot.slane %v1462_v54, 1 }
 0x25a   : > { %v1478_v50 = vadd.f32 %v1477_v26, %v1476_v10  ;;  %v1485_v46 = vadd.f32 %v1484_v22, %v1483_v18  ;;  %v1285_v49 = vpop.f32.mrb[9].mxu1  ;;  %v1419_v52 = vmax.f32 %v1387_v32, 0.0  ;;  %v1291_v39 = vadd.f32 %v3523_v35, %v4317_v30 }
 0x25b   : > { %v1418_v37 = vmax.f32 %v1386_v4, 0.0  ;;  %v1286_v59 = vadd.f32 %v1285_v49, %v4317_v30  ;;  %v1471_v60 = vadd.f32 %v1470_v23, %v1469_v6  ;;  %v1613_v57 = vsel %vm1612_vm1, %v4359_v63, %v4363_v61 }
 0x25c   : > { %v1479_v12 = vrot.slane %v1478_v50, 2  ;;  %v1486_v28 = vrot.slane %v1485_v46, 4  ;;  %v1493_v25 = vsel %vm631_vm0, %v1419_v52, 0.0  ;;  %v1389_v41 = vadd.f32 %v1291_v39, %v3952_v34 }
 0x25d   : > { %v1492_v36 = vsel %vm631_vm0, %v1418_v37, 0.0  ;;  %v1388_v7 = vadd.f32 %v1286_v59, %v3949_v31  ;;  %v3526_v1 = vpop.f32.mrb[10].mxu1  ;;  %v1472_v34 = vrot.slane %v1471_v60, 1  ;;  %v4378_v4 = vadd.f32 %v1463_v2, %v1462_v54 }
 0x25e   : > { %v1487_v45 = vadd.f32 %v1486_v28, %v1485_v46  ;;  %v1494_v10 = vadd.f32 %v1493_v25, %v1492_v36  ;;  %v1295_v6 = vpop.f32.mrb[11].mxu1  ;;  %v1421_v14 = vmax.f32 %v1389_v41, 0.0  ;;  %v1301_v16 = vadd.f32 %v3526_v1, %v4317_v30 }
 0x25f   : > { %v1420_v44 = vmax.f32 %v1388_v7, 0.0  ;;  %v1296_v21 = vadd.f32 %v1295_v6, %v4317_v30  ;;  %v1480_v43 = vadd.f32 %v1479_v12, %v1478_v50  ;;  %v4382_v12 = vadd.f32 %v1472_v34, %v1471_v60 }
 0x260   : > { %v1488_v31 = vrot.slane %v1487_v45, 2  ;;  %v1495_v51 = vrot.slane %v1494_v10, 4  ;;  %v1502_v23 = vsel %vm631_vm0, %v1421_v14, 0.0  ;;  %v1391_v22 = vadd.f32 %v1301_v16, %v3964_v42 }
 0x261   : > { %v1501_v26 = vsel %vm631_vm0, %v1420_v44, 0.0  ;;  %v1390_v18 = vadd.f32 %v1296_v21, %v3961_v38  ;;  %v3529_v32 = vpop.f32.mrb[12].mxu1  ;;  %v1481_v42 = vrot.slane %v1480_v43, 1 }
 0x262   : > { %v1489_v35 = vadd.f32 %v1488_v31, %v1487_v45  ;;  %v1496_v46 = vadd.f32 %v1495_v51, %v1494_v10  ;;  %v1503_v49 = vadd.f32 %v1502_v23, %v1501_v26  ;;  %v1305_v52 = vpop.f32.mrb[13].mxu1  ;;  %v1423_v37 = vmax.f32 %v1391_v22, 0.0 }
 0x263   : > { %v1422_v50 = vmax.f32 %v1390_v18, 0.0  ;;  %v1311_v39 = vadd.f32 %v3529_v32, %v4317_v30  ;;  %v1306_v59 = vadd.f32 %v1305_v52, %v4317_v30  ;;  %v4392_v21 = vadd.f32 %v1481_v42, %v1480_v43 }
 0x264   : > { %v1497_v28 = vrot.slane %v1496_v46, 2  ;;  %v1504_v38 = vrot.slane %v1503_v49, 4  ;;  %v1511_v25 = vsel %vm631_vm0, %v1423_v37, 0.0  ;;  %v1490_v1 = vrot.slane %v1489_v35, 1 }
 0x265   : > { %v1510_v54 = vsel %vm631_vm0, %v1422_v50, 0.0  ;;  %v1393_v36 = vadd.f32 %v1311_v39, %v3976_v53  ;;  %v1392_v41 = vadd.f32 %v1306_v59, %v3973_v48  ;;  %v3532_v7 = vpop.f32.mrb[14].mxu1  ;;  %v1615_v48 = vsel %vm1614_vm2, %v4378_v4, %v1613_v57 }
 0x266   : > { %v1498_v2 = vadd.f32 %v1497_v28, %v1496_v46  ;;  %v1505_v45 = vadd.f32 %v1504_v38, %v1503_v49  ;;  %v4388_v10 = vadd.f32 %v1511_v25, %v1510_v54  ;;  %v1315_v6 = vpop.f32.mrb[15].mxu1  ;;  %v1321_v44 = vadd.f32 %v3532_v7, %v4317_v30 }
 0x267   : > { %v1425_v60 = vmax.f32 %v1393_v36, 0.0  ;;  %v1424_v14 = vmax.f32 %v1392_v41, 0.0  ;;  %v1316_v16 = vadd.f32 %v1315_v6, %v4317_v30  ;;  %v4400_v18 = vadd.f32 %v1490_v1, %v1489_v35 }
 0x268   : > { %v1499_v34 = vrot.slane %v1498_v2, 1  ;;  %v1506_v31 = vrot.slane %v1505_v45, 2  ;;  %v1395_v23 = vadd.f32 %v1321_v44, %v3988_v62  ;;  %v1617_v49 = vsel %vm1616_vm3, %v4382_v12, %v1615_v48 }
 0x269   : > { %v1520_v53 = vsel %vm631_vm0, %v1425_v60, 0.0  ;;  %v1519_v51 = vsel %vm631_vm0, %v1424_v14, 0.0  ;;  %v1394_v26 = vadd.f32 %v1316_v16, %v3985_v58  ;;  %v3535_v22 = vpop.f32.mrb[16].mxu1  ;;  %v1619_v58 = vsel %vm1618_vm4, %v4392_v21, %v1617_v49 }
 0x26a   : > { %v1521_v32 = vadd.f32 %v1520_v53, %v1519_v51  ;;  %v1331_v43 = vadd.f32 %v3535_v22, %v4317_v30  ;;  %v1325_v46 = vpop.f32.mrb[17].mxu1  ;;  %v1427_v52 = vmax.f32 %v1395_v23, 0.0  ;;  %v1507_v50 = vadd.f32 %v1506_v31, %v1505_v45 }
 0x26b   : > { %v1426_v57 = vmax.f32 %v1394_v26, 0.0  ;;  %v1326_v37 = vadd.f32 %v1325_v46, %v4317_v30  ;;  %v4407_v62 = vadd.f32 %v1499_v34, %v1498_v2 }
 0x26c   : > { %v1397_v39 = vadd.f32 %v1331_v43, %v4000_v11  ;;  %v1529_v35 = vsel %vm631_vm0, %v1427_v52, 0.0  ;;  %v1508_v38 = vrot.slane %v1507_v50, 1  ;;  %v1621_v11 = vsel %vm1620_vm5, %v4400_v18, %v1619_v58 }
 0x26d   : > { %v1528_v59 = vsel %vm631_vm0, %v1426_v57, 0.0  ;;  %v1396_v42 = vadd.f32 %v1326_v37, %v3997_v5  ;;  %v3538_v28 = vpop.f32.mrb[18].mxu1  ;;  %v1623_v5 = vsel %vm1622_vm6, %v4407_v62, %v1621_v11  ;;  %v1522_v34 = vrot.slane %v1521_v32, 4 }
 0x26e   : > { %v1530_v25 = vadd.f32 %v1529_v35, %v1528_v59  ;;  %v1429_v54 = vmax.f32 %v1397_v39, 0.0  ;;  %v1335_v36 = vpop.f32.mrb[19].mxu1  ;;  %v1341_v7 = vadd.f32 %v3538_v28, %v4317_v30  ;;  %v4418_v2 = vadd.f32 %v1508_v38, %v1507_v50 }
 0x26f   : > { %v1428_v41 = vmax.f32 %v1396_v42, 0.0  ;;  %v1336_v1 = vadd.f32 %v1335_v36, %v4317_v30  ;;  %v1523_v37 = vadd.f32 %v1522_v34, %v1521_v32 }
 0x270   : > { %v1538_v45 = vsel %vm631_vm0, %v1429_v54, 0.0  ;;  %v1399_v60 = vadd.f32 %v1341_v7, %v4012_v24  ;;  %v1625_v16 = vsel %vm1624_vm7, %v4418_v2, %v1623_v5  ;;  %v1531_v31 = vrot.slane %v1530_v25, 4 }
 0x271   : > { %v1537_v6 = vsel %vm631_vm0, %v1428_v41, 0.0  ;;  %v1398_v14 = vadd.f32 %v1336_v1, %v4009_v20  ;;  %v3541_v44 = vpop.f32.mrb[20].mxu1  ;;  %3556 = vmatprep.mubr.msk.f32.mxu0 %vm631_vm0, %v1625_v16  ;;  %v1513_v24 = vrot.slane %v4388_v10, 4  ;;  %v1524_v41 = vrot.slane %v1523_v37, 2 }
 0x272   : > { %v1539_v48 = vadd.f32 %v1538_v45, %v1537_v6  ;;  %v1345_v53 = vpop.f32.mrb[21].mxu1  ;;  %v1431_v51 = vmax.f32 %v1399_v60, 0.0  ;;  %v1351_v26 = vadd.f32 %v3541_v44, %v4317_v30  ;;  %v1532_v50 = vadd.f32 %v1531_v31, %v1530_v25 }
 0x273   : > { %v1430_v23 = vmax.f32 %v1398_v14, 0.0  ;;  %v1346_v22 = vadd.f32 %v1345_v53, %v4317_v30  ;;  %v1514_v38 = vadd.f32 %v1513_v24, %v4388_v10 }
 0x274   : > { %v1540_v43 = vrot.slane %v1539_v48, 4  ;;  %v1547_v20 = vsel %vm631_vm0, %v1431_v51, 0.0  ;;  %v1401_v49 = vadd.f32 %v1351_v26, %v4024_v33  ;;  %v1533_v7 = vrot.slane %v1532_v50, 2 }
 0x275   : > { %v1546_v46 = vsel %vm631_vm0, %v1430_v23, 0.0  ;;  %v1400_v52 = vadd.f32 %v1346_v22, %v4021_v29  ;;  %v3544_v57 = vpop.f32.mrb[22].mxu1  ;;  %v1515_v44 = vrot.slane %v1514_v38, 2  ;;  %v1525_v51 = vadd.f32 %v1524_v41, %v1523_v37 }
 0x276   : > { %v1548_v39 = vadd.f32 %v1547_v20, %v1546_v46  ;;  %v1355_v58 = vpop.f32.mrb[23].mxu1  ;;  %v1433_v35 = vmax.f32 %v1401_v49, 0.0  ;;  %v1361_v42 = vadd.f32 %v3544_v57, %v4317_v30  ;;  %v1541_v54 = vadd.f32 %v1540_v43, %v1539_v48 }
 0x277   : > { %v1432_v59 = vmax.f32 %v1400_v52, 0.0  ;;  %v1356_v28 = vadd.f32 %v1355_v58, %v4317_v30  ;;  %v1534_v22 = vadd.f32 %v1533_v7, %v1532_v50  ;;  %v1516_v20 = vadd.f32 %v1515_v44, %v1514_v38 }
 0x278   : > { %v1549_v36 = vrot.slane %v1548_v39, 4  ;;  %v1556_v11 = vsel %vm631_vm0, %v1433_v35, 0.0  ;;  %v1403_v29 = vadd.f32 %v1361_v42, %v4036_v47  ;;  %v1542_v16 = vrot.slane %v1541_v54, 2 }
 0x279   : > { %v1555_v33 = vsel %vm631_vm0, %v1432_v59, 0.0  ;;  %v1402_v32 = vadd.f32 %v1356_v28, %v4033_v40  ;;  %v3547_v25 = vpop.f32.mrb[24].mxu1  ;;  %v1526_v58 = vrot.slane %v1525_v51, 1  ;;  %v1517_v37 = vrot.slane %v1516_v20, 1 }
 0x27a   : > { %v1550_v1 = vadd.f32 %v1549_v36, %v1548_v39  ;;  %v1557_v45 = vadd.f32 %v1556_v11, %v1555_v33  ;;  %v1365_v5 = vpop.f32.mrb[25].mxu1  ;;  %v1435_v6 = vmax.f32 %v1403_v29, 0.0  ;;  %v1371_v10 = vadd.f32 %v3547_v25, %v4317_v30 }
 0x27b   : > { %v1434_v60 = vmax.f32 %v1402_v32, 0.0  ;;  %v1366_v14 = vadd.f32 %v1365_v5, %v4317_v30  ;;  %v1543_v30 = vadd.f32 %v1542_v16, %v1541_v54  ;;  %v4451_v11 = vadd.f32 %v1526_v58, %v1525_v51 }
 0x27c   : > { %v1551_v34 = vrot.slane %v1550_v1, 2  ;;  %v1558_v31 = vrot.slane %v1557_v45, 4  ;;  %v1565_v47 = vsel %vm631_vm0, %v1435_v6, 0.0  ;;  %v1405_v48 = vadd.f32 %v1371_v10, %v4048_v56 }
 0x27d   : > { %v1564_v40 = vsel %vm631_vm0, %v1434_v60, 0.0  ;;  %v1404_v53 = vadd.f32 %v1366_v14, %v4045_v55  ;;  %v1535_v55 = vrot.slane %v1534_v22, 1  ;;  %v1544_v42 = vrot.slane %v1543_v30, 1 }
 0x27e   : > { %v1559_v23 = vadd.f32 %v1558_v31, %v1557_v45  ;;  %v1566_v26 = vadd.f32 %v1565_v47, %v1564_v40  ;;  %v1437_v24 = vmax.f32 %v1405_v48, 0.0  ;;  %v1552_v52 = vadd.f32 %v1551_v34, %v1550_v1 }
 0x27f   : > { %v1436_v43 = vmax.f32 %v1404_v53, 0.0  ;;  %v4453_v29 = vadd.f32 %v1535_v55, %v1534_v22  ;;  %v4455_v32 = vadd.f32 %v1517_v37, %v1516_v20  ;;  %v4457_v25 = vadd.f32 %v1544_v42, %v1543_v30  ;;  %v3258_v20 = vld [vmem:[%s5069_s4 + $0x88] sm:$0xff] }
 0x280   : > { %v1560_v46 = vrot.slane %v1559_v23, 2  ;;  %v1567_v49 = vrot.slane %v1566_v26, 4  ;;  %v1574_v57 = vsel %vm631_vm0, %v1437_v24, 0.0  ;;  %v1553_v36 = vrot.slane %v1552_v52, 1 }
 0x281   : > { %v1573_v39 = vsel %vm631_vm0, %v1436_v43, 0.0  ;;  %v1626_v45 = vsel %vm1612_vm1, %v4451_v11, %v4455_v32  ;;  %v1595_v48 = vrot.slane %v4313_v27, %v3800_v9  ;;  %v3257_v43 = vld [vmem:[%s5069_s4 + $0x80] sm:$0xff]  ;;  %v3259_v9 = vld [vmem:[%s5069_s4 + $0x90] sm:$0xff]  ;;  %v1717_v58 = vrot.slane %v4313_v27, %v3814_v13 }
 0x282   : > { %v1561_v35 = vadd.f32 %v1560_v46, %v1559_v23  ;;  %v1568_v56 = vadd.f32 %v1567_v49, %v1566_v26  ;;  %v1575_v59 = vadd.f32 %v1574_v57, %v1573_v39  ;;  %v4459_v1 = vadd.f32 %v1553_v36, %v1552_v52  ;;  %v3260_v46 = vld [vmem:[%s5069_s4 + $0x98] sm:$0xff]  ;;  %v3261_v52 = vld [vmem:[%s5069_s4 + $0xa0] sm:$0xff]  ;;  %v3262_v57 = vld [vmem:[%s5069_s4 + $0xa8] sm:$0xff] }
 0x283   : > { %v1627_v60 = vsel %vm1614_vm2, %v4453_v29, %v1626_v45  ;;  %v3667_v30 = vpack.c.bf16 %v3258_v20, %v3257_v43  ;;  %v3671_v49 = vpack.c.bf16 %v3260_v46, %v3259_v9  ;;  %v3675_v39 = vpack.c.bf16 %v3262_v57, %v3261_v52 }
 0x284   : > { %v1569_v28 = vrot.slane %v1568_v56, 2  ;;  %v1576_v50 = vrot.slane %v1575_v59, 4  ;;  %v1562_v38 = vrot.slane %v1561_v35, 1  ;;  %v1628_v14 = vsel %vm1616_vm3, %v4457_v25, %v1627_v60 }
 0x285   : > { %v1629_v16 = vsel %vm1618_vm4, %v4459_v1, %v1628_v14  ;;  %3668 = vmatprep.subr.bf16.mxu0 %v3667_v30  ;;  %3676 = vmatprep.subr.bf16.mxu1 %v3675_v39 }
 0x286   : > { %v1570_v54 = vadd.f32 %v1569_v28, %v1568_v56  ;;  %v1577_v33 = vadd.f32 %v1576_v50, %v1575_v59  ;;  %v4464_v5 = vadd.f32 %v1562_v38, %v1561_v35 }
 0x288   : > { %v1571_v41 = vrot.slane %v1570_v54, 1  ;;  %v1578_v7 = vrot.slane %v1577_v33, 2  ;;  %v1630_v31 = vsel %vm1620_vm5, %v4464_v5, %v1629_v16 }
 0x28a   : > { %v1579_v6 = vadd.f32 %v1578_v7, %v1577_v33  ;;  %v4468_v10 = vadd.f32 %v1571_v41, %v1570_v54 }
 0x28c   : > { %v1580_v44 = vrot.slane %v1579_v6, 1  ;;  %v1631_v47 = vsel %vm1622_vm6, %v4468_v10, %v1630_v31 }
 0x28e   : > { %v4474_v34 = vadd.f32 %v1580_v44, %v1579_v6 }
 0x290   : > { %v1632_v40 = vsel %vm1624_vm7, %v4474_v34, %v1631_v47 }
 0x291   : > { %3557 = vmatmul.mubr.msk.f32.vlgmr.msra.gmra.mrb[38].mxu0 %vm631_vm0, %v1632_v40 }
 0x292   : > { %3670 = vmatpush3.bf16.msra.mxu0 %v3667_v30 }
 0x293   : > { %3672 = vmatprep.subr.bf16.mxu0 %v3671_v49 }
 0x296   : > { %3674 = vmatpush3.bf16.msra.mxu0 %v3671_v49 }
 0x364   : > { %v3558_v53 = vpop.f32.mrb[38].mxu0 }
 0x365   : > { %v1709_v51 = vadd.f32 %v3558_v53, %v1595_v48  ;;  %v1703_v23 = vpop.f32.mrb[39].mxu0 }
 0x366   : > { %v1704_v26 = vadd.f32 %v1703_v23, %v1595_v48 }
 0x367   : > { %v1713_v24 = vmax.f32 %v1709_v51, 0.0 }
 0x368   : > { %v1712_v22 = vmax.f32 %v1704_v26, 0.0 }
 0x36a   : > { %3567 = vmatprep.mubr.msk.f32.mxu1 %vm631_vm0, %v1712_v22 }
 0x36b   : > { %3568 = vmatmul.mubr.msk.f32.vlgmr.msra.gmra.mrb[26].mxu1 %vm631_vm0, %v1713_v24 }
 0x36c   : > { %3678 = vmatpush3.bf16.msra.mxu1 %v3675_v39 }
 0x43e   : > { %v3569_v35 = vpop.f32.mrb[26].mxu1 }
 0x43f   : > { %v1796_v56 = vadd.f32 %v3569_v35, %v1717_v58  ;;  %v1790_v59 = vpop.f32.mrb[27].mxu1 }
 0x440   : > { %v1791_v55 = vadd.f32 %v1790_v59, %v1717_v58 }
 0x441   : > { %v1808_v37 = vrot.slane %v1796_v56, 1  ;;  %v1809_v42 = vrot.slane %v1796_v56, 2  ;;  %v1812_v53 = vrot.slane %v1796_v56, 5  ;;  %v1813_v22 = vrot.slane %v1796_v56, 6 }
 0x442   : > { %v1801_v28 = vrot.slane %v1791_v55, 1  ;;  %v1802_v50 = vrot.slane %v1791_v55, 2  ;;  %v1803_v36 = vrot.slane %v1791_v55, 3  ;;  %v1804_v38 = vrot.slane %v1791_v55, 4 }
 0x443   : > { %v1805_v54 = vrot.slane %v1791_v55, 5  ;;  %v1806_v33 = vrot.slane %v1791_v55, 6  ;;  %v1807_v41 = vrot.slane %v1791_v55, 7  ;;  %v4508_v7 = vadd.f32 %v1791_v55, %v4363_v61 }
 0x444   : > { %v4511_v45 = vadd.f32 %v1801_v28, %v4359_v63  ;;  %v4514_v13 = vadd.f32 %v1802_v50, %v4378_v4  ;;  %v4517_v6 = vadd.f32 %v1803_v36, %v4382_v12  ;;  %v4520_v60 = vadd.f32 %v1804_v38, %v4392_v21 }
 0x445   : > { %v4523_v14 = vadd.f32 %v1805_v54, %v4400_v18  ;;  %v4526_v44 = vadd.f32 %v1806_v33, %v4407_v62  ;;  %v4529_v61 = vadd.f32 %v1807_v41, %v4418_v2  ;;  %v1810_v63 = vrot.slane %v1796_v56, 3 }
 0x446   : > { %v1848_v16 = vmax.f32 %v4511_v45, 0.0  ;;  %v1849_v4 = vmax.f32 %v4514_v13, 0.0  ;;  %v1850_v12 = vmax.f32 %v4517_v6, 0.0  ;;  %v1851_v31 = vmax.f32 %v4520_v60, 0.0 }
 0x447   : > { %v1847_v21 = vmax.f32 %v4508_v7, 0.0  ;;  %v1852_v18 = vmax.f32 %v4523_v14, 0.0  ;;  %v1853_v47 = vmax.f32 %v4526_v44, 0.0  ;;  %v1811_v62 = vrot.slane %v1796_v56, 4 }
 0x448   : > { %v1854_v40 = vmax.f32 %v4529_v61, 0.0  ;;  %v1893_v2 = vrot.slane %v1848_v16, 7  ;;  %v1895_v48 = vrot.slane %v1849_v4, 6  ;;  %v1897_v51 = vrot.slane %v1850_v12, 5 }
 0x449   : > { %v1899_v23 = vrot.slane %v1851_v31, 4  ;;  %v1901_v26 = vrot.slane %v1852_v18, 3  ;;  %v1814_v43 = vrot.slane %v1796_v56, 7  ;;  %v4553_v20 = vadd.f32 %v1796_v56, %v4455_v32 }
 0x44a   : > { %v1894_v24 = vsel %vm1612_vm1, %v1893_v2, %v1847_v21  ;;  %v4556_v9 = vadd.f32 %v1808_v37, %v4451_v11  ;;  %v4560_v46 = vadd.f32 %v1809_v42, %v4453_v29  ;;  %v4563_v49 = vadd.f32 %v1810_v63, %v4457_v25 }
 0x44b   : > { %v1896_v30 = vsel %vm1614_vm2, %v1895_v48, %v1894_v24  ;;  %v4566_v52 = vadd.f32 %v1811_v62, %v4459_v1  ;;  %v1903_v32 = vrot.slane %v1853_v47, 2  ;;  %v4572_v39 = vadd.f32 %v1812_v53, %v4464_v5  ;;  %v3264_v24 = vld [vmem:[%s5069_s4 + $0xb8] sm:$0xff] }
 0x44c   : > { %v1898_v57 = vsel %vm1616_vm3, %v1897_v51, %v1896_v30  ;;  %v4575_v11 = vadd.f32 %v1813_v22, %v4468_v10  ;;  %v4579_v58 = vadd.f32 %v1814_v43, %v4474_v34  ;;  %v1856_v25 = vmax.f32 %v4556_v9, 0.0  ;;  %v3263_v22 = vld [vmem:[%s5069_s4 + $0xb0] sm:$0xff] }
 0x44d   : > { %v1900_v29 = vsel %vm1618_vm4, %v1899_v23, %v1898_v57  ;;  %v1857_v1 = vmax.f32 %v4560_v46, 0.0  ;;  %v1905_v56 = vrot.slane %v1854_v40, 1  ;;  %v1858_v5 = vmax.f32 %v4563_v49, 0.0 }
 0x44e   : > { %v1902_v35 = vsel %vm1620_vm5, %v1901_v26, %v1900_v29  ;;  %v1859_v59 = vmax.f32 %v4566_v52, 0.0  ;;  %v1855_v55 = vmax.f32 %v4553_v20, 0.0  ;;  %v1860_v34 = vmax.f32 %v4572_v39, 0.0 }
 0x44f   : > { %v1904_v10 = vsel %vm1622_vm6, %v1903_v32, %v1902_v35  ;;  %v1907_v37 = vrot.slane %v1856_v25, 7  ;;  %v1861_v28 = vmax.f32 %v4575_v11, 0.0  ;;  %v1909_v50 = vrot.slane %v1857_v1, 6 }
 0x450   : > { %v1906_v42 = vsel %vm1624_vm7, %v1905_v56, %v1904_v10  ;;  %v1862_v36 = vmax.f32 %v4579_v58, 0.0  ;;  %v1911_v54 = vrot.slane %v1858_v5, 5  ;;  %v1913_v41 = vrot.slane %v1859_v59, 4 }
 0x451   : > { %3578 = vmatprep.mubr.msk.f32.mxu0 %vm631_vm0, %v1906_v42  ;;  %v1908_v38 = vsel %vm1612_vm1, %v1907_v37, %v1855_v55  ;;  %v1915_v62 = vrot.slane %v1860_v34, 3  ;;  %v1917_v48 = vrot.slane %v1861_v28, 2  ;;  %v3679_v43 = vpack.c.bf16 %v3264_v24, %v3263_v22  ;;  %v3285_v37 = vld [vmem:[%s5069_s4 + $0xc0] sm:$0xff]  ;;  %v3286_v42 = vld [vmem:[%s5069_s4 + $0xc8] sm:$0xff] }
 0x452   : > { %v1910_v33 = vsel %vm1614_vm2, %v1909_v50, %v1908_v38  ;;  %v1919_v51 = vrot.slane %v1862_v36, 1  ;;  %v1876_v30 = vrot.slane %v4313_v27, %v3818_v15  ;;  %v3287_v15 = vld [vmem:[%s5069_s4 + $0xd0] sm:$0xff]  ;;  %v3683_v50 = vpack.c.bf16 %v3286_v42, %v3285_v37  ;;  %v3288_v38 = vld [vmem:[%s5069_s4 + $0xd8] sm:$0xff] }
 0x453   : > { %v1912_v63 = vsel %vm1616_vm3, %v1911_v54, %v1910_v33  ;;  %3680 = vmatprep.subr.bf16.mxu1 %v3679_v43  ;;  %v3687_v54 = vpack.c.bf16 %v3288_v38, %v3287_v15  ;;  %v2005_v33 = vrot.slane %v4313_v27, %v3822_v17 }
 0x454   : > { %v1914_v2 = vsel %vm1618_vm4, %v1913_v41, %v1912_v63  ;;  %3682 = vmatpush3.bf16.msra.mxu1 %v3679_v43  ;;  %3684 = vmatprep.subr.bf16.mxu0 %v3683_v50 }
 0x455   : > { %v1916_v53 = vsel %vm1620_vm5, %v1915_v62, %v1914_v2 }
 0x456   : > { %v1918_v23 = vsel %vm1622_vm6, %v1917_v48, %v1916_v53 }
 0x457   : > { %v1920_v26 = vsel %vm1624_vm7, %v1919_v51, %v1918_v23 }
 0x458   : > { %3579 = vmatmul.mubr.msk.f32.vlgmr.msra.gmra.mrb[40].mxu0 %vm631_vm0, %v1920_v26 }
 0x459   : > { %3686 = vmatpush3.bf16.msra.mxu0 %v3683_v50 }
 0x45a   : > { %3688 = vmatprep.subr.bf16.mxu0 %v3687_v54 }
 0x45d   : > { %3690 = vmatpush3.bf16.msra.mxu0 %v3687_v54 }
 0x52b   : > { %v3580_v57 = vpop.f32.mrb[40].mxu0 }
 0x52c   : > { %v1997_v32 = vadd.f32 %v3580_v57, %v1876_v30  ;;  %v1991_v29 = vpop.f32.mrb[41].mxu0 }
 0x52d   : > { %v1992_v35 = vadd.f32 %v1991_v29, %v1876_v30 }
 0x52e   : > { %v2001_v10 = vmax.f32 %v1997_v32, 0.0 }
 0x52f   : > { %v2000_v56 = vmax.f32 %v1992_v35, 0.0 }
 0x531   : > { %3589 = vmatprep.mubr.msk.f32.mxu1 %vm631_vm0, %v2000_v56 }
 0x532   : > { %3590 = vmatmul.mubr.msk.f32.vlgmr.msra.gmra.mrb[28].mxu1 %vm631_vm0, %v2001_v10 }
 0x605   : > { %v3591_v41 = vpop.f32.mrb[28].mxu1 }
 0x606   : > { %v2084_v63 = vadd.f32 %v3591_v41, %v2005_v33  ;;  %v2078_v62 = vpop.f32.mrb[29].mxu1 }
 0x607   : > { %v2079_v2 = vadd.f32 %v2078_v62, %v2005_v33 }
 0x608   : > { %v2096_v48 = vrot.slane %v2084_v63, 1  ;;  %v2097_v53 = vrot.slane %v2084_v63, 2  ;;  %v2101_v37 = vrot.slane %v2084_v63, 6  ;;  %v2102_v15 = vrot.slane %v2084_v63, 7 }
 0x609   : > { %v2089_v51 = vrot.slane %v2079_v2, 1  ;;  %v2090_v23 = vrot.slane %v2079_v2, 2  ;;  %v2091_v26 = vrot.slane %v2079_v2, 3  ;;  %v2092_v22 = vrot.slane %v2079_v2, 4 }
 0x60a   : > { %v2093_v24 = vrot.slane %v2079_v2, 5  ;;  %v2094_v43 = vrot.slane %v2079_v2, 6  ;;  %v2095_v30 = vrot.slane %v2079_v2, 7  ;;  %v4645_v57 = vadd.f32 %v2079_v2, %v1847_v21 }
 0x60b   : > { %v4649_v17 = vadd.f32 %v2089_v51, %v1848_v16  ;;  %v4653_v27 = vadd.f32 %v2090_v23, %v1849_v4  ;;  %v4657_v32 = vadd.f32 %v2091_v26, %v1850_v12  ;;  %v4661_v29 = vadd.f32 %v2092_v22, %v1851_v31 }
 0x60c   : > { %v4665_v7 = vadd.f32 %v2093_v24, %v1852_v18  ;;  %v4669_v45 = vadd.f32 %v2094_v43, %v1853_v47  ;;  %v4673_v13 = vadd.f32 %v2095_v30, %v1854_v40  ;;  %v2098_v16 = vrot.slane %v2084_v63, 3 }
 0x60d   : > { %v2136_v6 = vmax.f32 %v4649_v17, 0.0  ;;  %v2137_v4 = vmax.f32 %v4653_v27, 0.0  ;;  %v2138_v60 = vmax.f32 %v4657_v32, 0.0  ;;  %v2139_v12 = vmax.f32 %v4661_v29, 0.0 }
 0x60e   : > { %v2135_v14 = vmax.f32 %v4645_v57, 0.0  ;;  %v2140_v31 = vmax.f32 %v4665_v7, 0.0  ;;  %v2141_v44 = vmax.f32 %v4669_v45, 0.0  ;;  %v2099_v21 = vrot.slane %v2084_v63, 4 }
 0x60f   : > { %v2142_v61 = vmax.f32 %v4673_v13, 0.0  ;;  %v2274_v18 = vrot.slane %v2136_v6, 7  ;;  %v2276_v47 = vrot.slane %v2137_v4, 6  ;;  %v2100_v40 = vrot.slane %v2084_v63, 5 }
 0x610   : > { %v2278_v35 = vrot.slane %v2138_v60, 5  ;;  %v2280_v56 = vrot.slane %v2139_v12, 4  ;;  %v2282_v10 = vrot.slane %v2140_v31, 3  ;;  %v4698_v50 = vadd.f32 %v2084_v63, %v1855_v55 }
 0x611   : > { %v2275_v42 = vsel %vm1612_vm1, %v2274_v18, %v2135_v14  ;;  %v4702_v38 = vadd.f32 %v2096_v48, %v1856_v25  ;;  %v4707_v33 = vadd.f32 %v2097_v53, %v1857_v1  ;;  %v4711_v41 = vadd.f32 %v2098_v16, %v1858_v5 }
 0x612   : > { %v2277_v54 = vsel %vm1614_vm2, %v2276_v47, %v2275_v42  ;;  %v4715_v62 = vadd.f32 %v2099_v21, %v1859_v59  ;;  %v2284_v9 = vrot.slane %v2141_v44, 2  ;;  %v4722_v25 = vadd.f32 %v2100_v40, %v1860_v34  ;;  %v3292_v42 = vld [vmem:[%s5069_s4 + $0xf8] sm:$0xff] }
 0x613   : > { %v2279_v20 = vsel %vm1616_vm3, %v2278_v35, %v2277_v54  ;;  %v4726_v46 = vadd.f32 %v2101_v37, %v1861_v28  ;;  %v4731_v52 = vadd.f32 %v2102_v15, %v1862_v36  ;;  %v2144_v1 = vmax.f32 %v4702_v38, 0.0  ;;  %v3289_v35 = vld [vmem:[%s5069_s4 + $0xe0] sm:$0xff]  ;;  %v3291_v37 = vld [vmem:[%s5069_s4 + $0xf0] sm:$0xff] }
 0x614   : > { %v2281_v49 = vsel %vm1618_vm4, %v2280_v56, %v2279_v20  ;;  %v2145_v5 = vmax.f32 %v4707_v33, 0.0  ;;  %v2286_v39 = vrot.slane %v2142_v61, 1  ;;  %v2146_v55 = vmax.f32 %v4711_v41, 0.0  ;;  %v3290_v56 = vld [vmem:[%s5069_s4 + $0xe8] sm:$0xff] }
 0x615   : > { %v2283_v59 = vsel %vm1620_vm5, %v2282_v10, %v2281_v49  ;;  %v5077_v11 = vmax.f32 %v4715_v62, 0.0  ;;  %v2143_v28 = vmax.f32 %v4698_v50, 0.0  ;;  %v2148_v58 = vmax.f32 %v4722_v25, 0.0 }
 0x616   : > { %v2285_v34 = vsel %vm1622_vm6, %v2284_v9, %v2283_v59  ;;  %v2288_v36 = vrot.slane %v2144_v1, 7  ;;  %v5075_v2 = vmax.f32 %v4726_v46, 0.0  ;;  %v2290_v48 = vrot.slane %v2145_v5, 6 }
 0x617   : > { %v2287_v63 = vsel %vm1624_vm7, %v2286_v39, %v2285_v34  ;;  %v5076_v53 = vmax.f32 %v4731_v52, 0.0  ;;  %v2292_v23 = vrot.slane %v2146_v55, 5  ;;  %v2294_v22 = vrot.slane %v5077_v11, 4  ;;  %v3272_v11 = vld [vmem:[%s5068_s3 + $0x98] sm:$0xff] }
 0x618   : > { %3600 = vmatprep.mubr.msk.f32.mxu0 %vm631_vm0, %v2287_v63  ;;  %v2289_v51 = vsel %vm1612_vm1, %v2288_v36, %v2143_v28  ;;  %v2296_v43 = vrot.slane %v2148_v58, 3  ;;  %v2298_v16 = vrot.slane %v5075_v2, 2  ;;  %v3691_v10 = vpack.c.bf16 %v3290_v56, %v3289_v35  ;;  %v2219_v35 = vld [vmem:[%s5068_s3 + $0x20] sm:$0xff] }
 0x619   : > { %v2291_v26 = vsel %vm1614_vm2, %v2290_v48, %v2289_v51  ;;  %v2300_v18 = vrot.slane %v5076_v53, 1  ;;  %v3695_v15 = vpack.c.bf16 %v3292_v42, %v3291_v37  ;;  %v3724_v54 = vmov 1966171168  }
 0x61a   : > { %v2293_v24 = vsel %vm1616_vm3, %v2292_v23, %v2291_v26  ;;  %3692 = vmatprep.subr.bf16.mxu1 %v3691_v10  ;;  %v2385_v20 = vunpack.c.l.s4 %v3724_v54  ;;  %v2166_v17 = vrot.slane %v2138_v60, %v3797_v8  ;;  %v2174_v32 = vrot.slane %v2140_v31, %v3797_v8 }
 0x61b   : > { %v2295_v30 = vsel %vm1618_vm4, %v2294_v22, %v2293_v24  ;;  %3694 = vmatpush3.bf16.msra.mxu1 %v3691_v10  ;;  %v2186_v45 = vrot.slane %v2143_v28, %v3797_v8  ;;  %v2198_v38 = vrot.slane %v2146_v55, %v3797_v8  ;;  %v2206_v55 = vrot.slane %v2148_v58, %v3797_v8 }
 0x61c   : > { %v2297_v21 = vsel %vm1620_vm5, %v2296_v43, %v2295_v30  ;;  %3696 = vmatprep.subr.bf16.mxu1 %v3695_v15  ;;  %v2386_v9 = vunpack.c.0.s8 %v2385_v20  ;;  %v2215_v30 = vld [vmem:[%s5068_s3] sm:$0xff] }
 0x61d   : > { %v2299_v47 = vsel %vm1622_vm6, %v2298_v16, %v2297_v21  ;;  %v2216_v16 = vld [vmem:[%s5068_s3 + $0x8] sm:$0xff]  ;;  %v2217_v21 = vld [vmem:[%s5068_s3 + $0x10] sm:$0xff] }
 0x61e   : > { %v2301_v40 = vsel %vm1624_vm7, %v2300_v18, %v2299_v47  ;;  %v4784_v49 = vsub.s32 %v2386_v9, %v3786_v3  ;;  %v3270_v9 = vld [vmem:[%s5068_s3 + $0x88] sm:$0xff] }
 0x61f   : > { %3601 = vmatmul.mubr.msk.f32.vlgmr.msra.gmra.mrb[42].mxu0 %vm631_vm0, %v2301_v40  ;;  %3698 = vmatpush3.bf16.msra.mxu1 %v3695_v15  ;;  %v2218_v15 = vld [vmem:[%s5068_s3 + $0x18] sm:$0xff] }
 0x6f2   : > { %v3602_v59 = vpop.f32.mrb[42].mxu0 }
 0x6f3   : > { %v2372_v39 = vpop.f32.mrb[43].mxu0  ;;  %v2439_v24 = vrot.slane %v3602_v59, %v4784_v49  ;;  %v2432_v54 = vcombine.high %v3602_v59, %v3602_v59 }
 0x6f4   : > { %v2383_v34 = vcombine.high %v2372_v39, %v2372_v39  ;;  %v2390_v36 = vrot.slane %v2372_v39, %v4784_v49 }
 0x6f5   : > { %v2447_v20 = vcombine.high %v2439_v24, %v2439_v24 }
 0x6f6   : > { %v2397_v63 = vrot.slane %v2383_v34, %v4784_v49  ;;  %v2398_v48 = vcombine.high %v2390_v36, %v2390_v36  ;;  %v2406_v51 = vrot.slane %v2390_v36, %v4784_v49  ;;  %v3269_v34 = vld [vmem:[%s5068_s3 + $0x80] sm:$0xff]  ;;  %v3271_v36 = vld [vmem:[%s5068_s3 + $0x90] sm:$0xff] }
 0x6f8   : > { %v2399_v23 = vcombine.high %v2397_v63, %v2397_v63  ;;  %v2413_v26 = vrot.slane %v2397_v63, %v4784_v49  ;;  %v2420_v22 = vrot.slane %v2398_v48, %v4784_v49  ;;  %v2428_v43 = vcombine.high %v2406_v51, %v2406_v51 }
 0x6f9   : > { %v2484_v56 = vrot.slane %v2406_v51, %v3797_v8  ;;  %v2455_v63 = vrot.slane %v2439_v24, %v4784_v49  ;;  %v2220_v24 = vld [vmem:[%s5068_s3 + $0x28] sm:$0xff] }
 0x6fa   : > { %v2427_v18 = vrot.slane %v2399_v23, %v4784_v49  ;;  %v2429_v47 = vcombine.high %v2413_v26, %v2413_v26  ;;  %v2430_v40 = vcombine.high %v2420_v22, %v2420_v22  ;;  %v2488_v10 = vrot.slane %v2420_v22, %v3797_v8 }
 0x6fb   : > { %v2492_v37 = vrot.slane %v2428_v43, %v3797_v8  ;;  %v2500_v42 = vrot.slane %v2413_v26, %v3797_v8  ;;  %v2561_v48 = vmul.f32 %v2484_v56, %v2215_v30  ;;  %v2446_v30 = vrot.slane %v2432_v54, %v4784_v49 }
 0x6fc   : > { %v2496_v39 = vrot.slane %v2430_v40, %v3797_v8  ;;  %v2562_v51 = vmul.f32 %v2488_v10, %v2216_v16  ;;  %v2431_v23 = vcombine.high %v2427_v18, %v2427_v18  ;;  %v2504_v26 = vrot.slane %v2427_v18, %v3797_v8  ;;  %v3273_v16 = vld [vmem:[%s5068_s3 + $0xa0] sm:$0xff] }
 0x6fd   : > { %v2563_v59 = vmul.f32 %v2492_v37, %v2217_v21  ;;  %v2508_v22 = vrot.slane %v2429_v47, %v3797_v8  ;;  %v2565_v40 = vmul.f32 %v2500_v42, %v2219_v35  ;;  %v2577_v2 = vadd.f32 %v3269_v34, %v2561_v48  ;;  %v2221_v21 = vld [vmem:[%s5068_s3 + $0x30] sm:$0xff] }
 0x6fe   : > { %v2564_v43 = vmul.f32 %v2496_v39, %v2218_v15  ;;  %v2578_v0 = vadd.f32 %v3270_v9, %v2562_v51  ;;  %v2469_v18 = vrot.slane %v2447_v20, %v4784_v49  ;;  %v2512_v10 = vrot.slane %v2431_v23, %v3797_v8  ;;  %v3274_v39 = vld [vmem:[%s5068_s3 + $0xa8] sm:$0xff] }
 0x6ff   : > { %v2579_v53 = vadd.f32 %v3271_v36, %v2563_v59  ;;  %v2593_v35 = vmax.f32 %v2577_v2, 0.0  ;;  %v2566_v42 = vmul.f32 %v2504_v26, %v2220_v24  ;;  %v2477_v15 = vcombine.high %v2455_v63, %v2455_v63  ;;  %v3275_v2 = vld [vmem:[%s5068_s3 + $0xb0] sm:$0xff]  ;;  %v2224_v23 = vld [vmem:[%s5068_s3 + $0x48] sm:$0xff]  ;;  %v3276_v24 = vld [vmem:[%s5068_s3 + $0xb8] sm:$0xff] }
 0x700   : > { %v2594_v47 = vmax.f32 %v2578_v0, 0.0  ;;  %v2580_v37 = vadd.f32 %v3272_v11, %v2564_v43  ;;  %v2516_v54 = vrot.slane %v2455_v63, %v3797_v8  ;;  %v2581_v9 = vadd.f32 %v3273_v16, %v2565_v40  ;;  %v2222_v0 = vld [vmem:[%s5068_s3 + $0x38] sm:$0xff]  ;;  %v2223_v11 = vld [vmem:[%s5068_s3 + $0x40] sm:$0xff] }
 0x701   : > { %v2595_v56 = vmax.f32 %v2579_v53, 0.0  ;;  %3611 = vmatprep.mubr.msk.f32.mxu1 %vm631_vm0, %v2593_v35  ;;  %v2567_v34 = vmul.f32 %v2508_v22, %v2221_v21  ;;  %v2448_v53 = vcombine.high %v2446_v30, %v2446_v30  ;;  %v2462_v20 = vrot.slane %v2446_v30, %v4784_v49  ;;  %v2225_v30 = vld [vmem:[%s5068_s3 + $0x50] sm:$0xff]  ;;  %v3277_v16 = vld [vmem:[%s5068_s3 + $0xc0] sm:$0xff] }
 0x702   : > { %3612 = vmatmul.mubr.msk.f32.vlgmr.msra.gmra.mrb[30].mxu1 %vm631_vm0, %v2594_v47  ;;  %v2479_v36 = vcombine.high %v2469_v18, %v2469_v18  ;;  %v2520_v63 = vrot.slane %v2469_v18, %v3797_v8  ;;  %v2596_v48 = vmax.f32 %v2580_v37, 0.0  ;;  %v2582_v51 = vadd.f32 %v3274_v39, %v2566_v42  ;;  %v2227_v39 = vld [vmem:[%s5068_s3 + $0x60] sm:$0xff] }
 0x703   : > { %3614 = vmatprep.mubr.msk.f32.mxu1 %vm631_vm0, %v2595_v56  ;;  %v2568_v59 = vmul.f32 %v2512_v10, %v2222_v0  ;;  %v2524_v26 = vrot.slane %v2477_v15, %v3797_v8  ;;  %v2569_v22 = vmul.f32 %v2516_v54, %v2223_v11  ;;  %v2597_v43 = vmax.f32 %v2581_v9, 0.0  ;;  %v3278_v9 = vld [vmem:[%s5068_s3 + $0xc8] sm:$0xff] }
 0x704   : > { %v2583_v40 = vadd.f32 %v3275_v2, %v2567_v34  ;;  %v2476_v21 = vrot.slane %v2448_v53, %v4784_v49  ;;  %v2478_v18 = vcombine.high %v2462_v20, %v2462_v20  ;;  %v2528_v47 = vrot.slane %v2479_v36, %v3797_v8  ;;  %v2226_v49 = vld [vmem:[%s5068_s3 + $0x58] sm:$0xff]  ;;  %v3279_v34 = vld [vmem:[%s5068_s3 + $0xd0] sm:$0xff] }
 0x705   : > { %v2570_v35 = vmul.f32 %v2520_v63, %v2224_v23  ;;  %v2598_v56 = vmax.f32 %v2582_v51, 0.0  ;;  %v2584_v10 = vadd.f32 %v3276_v24, %v2568_v59  ;;  %v2532_v37 = vrot.slane %v2462_v20, %v3797_v8  ;;  %v3280_v59 = vld [vmem:[%s5068_s3 + $0xd8] sm:$0xff]  ;;  %v2228_v23 = vld [vmem:[%s5068_s3 + $0x68] sm:$0xff] }
 0x706   : > { %3615 = vmatmul.mubr.msk.f32.gmra.mrb[32].mxu1 %vm631_vm0, %v2596_v48  ;;  %v2571_v42 = vmul.f32 %v2524_v26, %v2225_v30  ;;  %v2599_v15 = vmax.f32 %v2583_v40, 0.0  ;;  %v2585_v54 = vadd.f32 %v3277_v16, %v2569_v22  ;;  %v2480_v0 = vcombine.high %v2476_v21, %v2476_v21  ;;  %v3281_v26 = vld [vmem:[%s5068_s3 + $0xe0] sm:$0xff]  ;;  %v2229_v22 = vld [vmem:[%s5068_s3 + $0x70] sm:$0xff] }
 0x707   : > { %3617 = vmatprep.mubr.msk.f32.mxu1 %vm631_vm0, %v2597_v43  ;;  %v2536_v11 = vrot.slane %v2476_v21, %v3797_v8  ;;  %v2600_v2 = vmax.f32 %v2584_v10, 0.0  ;;  %v2586_v53 = vadd.f32 %v3278_v9, %v2570_v35  ;;  %v2572_v20 = vmul.f32 %v2528_v47, %v2226_v49  ;;  %v2230_v35 = vld [vmem:[%s5068_s3 + $0x78] sm:$0xff] }
 0x708   : > { %v2540_v36 = vrot.slane %v2478_v18, %v3797_v8  ;;  %v2573_v63 = vmul.f32 %v2532_v37, %v2227_v39  ;;  %v2601_v48 = vmax.f32 %v2585_v54, 0.0  ;;  %v2587_v51 = vadd.f32 %v3279_v34, %v2571_v42  ;;  %v3282_v18 = vld [vmem:[%s5068_s3 + $0xe8] sm:$0xff]  ;;  %v3284_v9 = vld [vmem:[%s5068_s3 + $0xf8] sm:$0xff] }
 0x709   : > { %v2544_v43 = vrot.slane %v2480_v0, %v3797_v8  ;;  %v2602_v40 = vmax.f32 %v2586_v53, 0.0  ;;  %v2588_v24 = vadd.f32 %v3280_v59, %v2572_v20  ;;  %v2574_v30 = vmul.f32 %v2536_v11, %v2228_v23  ;;  %v3715_v11 = vld [vmem:[%s5070_s5] sm:$0x3f] }
 0x70a   : > { %3618 = vmatmul.mubr.msk.f32.gmra.mrb[34].mxu1 %vm631_vm0, %v2598_v56  ;;  %v2603_v16 = vmax.f32 %v2587_v51, 0.0  ;;  %v2589_v21 = vadd.f32 %v3281_v26, %v2573_v63  ;;  %v2575_v47 = vmul.f32 %v2540_v36, %v2229_v22  ;;  %v3283_v56 = vld [vmem:[%s5068_s3 + $0xf0] sm:$0xff]  ;;  %v2158_v20 = vrot.slane %v2136_v6, %v3797_v8 }
 0x70b   : > { %3620 = vmatprep.mubr.msk.f32.mxu1 %vm631_vm0, %v2599_v15  ;;  %v2604_v10 = vmax.f32 %v2588_v24, 0.0  ;;  %v2590_v37 = vadd.f32 %v3282_v18, %v2574_v30  ;;  %v2576_v42 = vmul.f32 %v2544_v43, %v2230_v35 }
 0x70c   : > { %v2605_v15 = vmax.f32 %v2589_v21, 0.0  ;;  %v2591_v54 = vadd.f32 %v3283_v56, %v2575_v47  ;;  %v2170_v56 = vrot.slane %v2139_v12, %v3797_v8 }
 0x70d   : > { %v2606_v49 = vmax.f32 %v2590_v37, 0.0  ;;  %v2592_v39 = vadd.f32 %v3284_v9, %v2576_v42 }
 0x70e   : > { %3621 = vmatmul.mubr.msk.f32.gmra.mrb[36].mxu1 %vm631_vm0, %v2600_v2  ;;  %v2607_v34 = vmax.f32 %v2591_v54, 0.0  ;;  %v4930_v2 = vrot.slane %v3715_v11, %v3826_v19  ;;  %v4943_v19 = vld [vmem:[%s5071_s6] sm:$0xff]  ;;  %v2182_v54 = vrot.slane %v2142_v61, %v3797_v8 }
 0x70f   : > { %3623 = vmatprep.mubr.msk.f32.mxu1 %vm631_vm0, %v2601_v48  ;;  %v2608_v0 = vmax.f32 %v2592_v39, 0.0  ;;  %v2154_v48 = vrot.slane %v2135_v14, %v3797_v8  ;;  %v2162_v14 = vrot.slane %v2137_v4, %v3797_v8  ;;  %v2178_v39 = vrot.slane %v2141_v44, %v3797_v8 }
 0x712   : > { %3624 = vmatmul.mubr.msk.f32.gmra.mrb[38].mxu1 %vm631_vm0, %v2602_v40 }
 0x713   : > { %3626 = vmatprep.mubr.msk.f32.mxu1 %vm631_vm0, %v2603_v16 }
 0x716   : > { %3627 = vmatmul.mubr.msk.f32.gmra.mrb[40].mxu1 %vm631_vm0, %v2604_v10 }
 0x717   : > { %3629 = vmatprep.mubr.msk.f32.mxu1 %vm631_vm0, %v2605_v15 }
 0x71a   : > { %3630 = vmatmul.mubr.msk.f32.gmra.mrb[42].mxu1 %vm631_vm0, %v2606_v49 }
 0x71b   : > { %3632 = vmatprep.mubr.msk.f32.mxu1 %vm631_vm0, %v2607_v34 }
 0x71e   : > { %3633 = vmatmul.mubr.msk.f32.gmra.mrb[44].mxu1 %vm631_vm0, %v2608_v0 }
 0x7d5   : > { %v3613_v53 = vpop.f32.mrb[30].mxu1 }
 0x7d6   : > { %v2733_v36 = vadd.f32 %v3613_v53, %v4930_v2  ;;  %v2727_v63 = vpop.f32.mrb[31].mxu1 }
 0x7d7   : > { %v2728_v51 = vadd.f32 %v2727_v63, %v4930_v2 }
 0x7d8   : > { %v2807_v59 = vadd.f32 %v2733_v36, %v2158_v20  ;;  %v2190_v20 = vrot.slane %v2144_v1, %v3797_v8 }
 0x7d9   : > { %v2806_v23 = vadd.f32 %v2728_v51, %v2154_v48  ;;  %v3616_v26 = vpop.f32.mrb[32].mxu1 }
 0x7da   : > { %v2823_v22 = vmax.f32 %v2807_v59, 0.0  ;;  %v2743_v6 = vadd.f32 %v3616_v26, %v4930_v2  ;;  %v2737_v43 = vpop.f32.mrb[33].mxu1 }
 0x7db   : > { %v2822_v57 = vmax.f32 %v2806_v23, 0.0  ;;  %v2738_v40 = vadd.f32 %v2737_v43, %v4930_v2 }
 0x7dc   : > { %v2809_v24 = vadd.f32 %v2743_v6, %v2166_v17  ;;  %v2840_v30 = vmul.f32 %v4943_v19, %v2823_v22  ;;  %v2194_v6 = vrot.slane %v2145_v5, %v3797_v8 }
 0x7dd   : > { %v2808_v16 = vadd.f32 %v2738_v40, %v2162_v14  ;;  %v3619_v21 = vpop.f32.mrb[34].mxu1  ;;  %v2839_v18 = vmul.f32 %v4943_v19, %v2822_v57 }
 0x7de   : > { %v2825_v47 = vmax.f32 %v2809_v24, 0.0  ;;  %v2753_v60 = vadd.f32 %v3619_v21, %v4930_v2  ;;  %v2747_v35 = vpop.f32.mrb[35].mxu1  ;;  %v2858_v27 = vsel %vm631_vm0, %v2840_v30, 0.0  ;;  %v5078_v30 = vmax.f32 %v4715_v62, 0.0 }
 0x7df   : > { %v2824_v4 = vmax.f32 %v2808_v16, 0.0  ;;  %v2748_v10 = vadd.f32 %v2747_v35, %v4930_v2  ;;  %2859 = vadd.xlane.f32.xlu1 %v2858_v27  ;;  %v2855_v37 = vsel %vm631_vm0, %v2839_v18, 0.0 }
 0x7e0   : > { %v2811_v42 = vadd.f32 %v2753_v60, %v2174_v32  ;;  %2856 = vadd.xlane.f32.xlu0 %v2855_v37  ;;  %v2842_v7 = vmul.f32 %v4943_v19, %v2825_v47  ;;  %v2202_v16 = vrot.slane %v5078_v30, %v3797_v8  ;;  %v5080_v37 = vmax.f32 %v4726_v46, 0.0 }
 0x7e1   : > { %v2810_v31 = vadd.f32 %v2748_v10, %v2170_v56  ;;  %v3622_v15 = vpop.f32.mrb[36].mxu1  ;;  %v2841_v0 = vmul.f32 %v4943_v19, %v2824_v4  ;;  %v5079_v4 = vmax.f32 %v4731_v52, 0.0 }
 0x7e2   : > { %v2763_v9 = vadd.f32 %v3622_v15, %v4930_v2  ;;  %v2757_v49 = vpop.f32.mrb[37].mxu1  ;;  %v2864_v29 = vsel %vm631_vm0, %v2842_v7, 0.0  ;;  %v2827_v12 = vmax.f32 %v2811_v42, 0.0  ;;  %v2210_v42 = vrot.slane %v5080_v37, %v3797_v8 }
 0x7e3   : > { %v2758_v34 = vadd.f32 %v2757_v49, %v4930_v2  ;;  %v2826_v61 = vmax.f32 %v2810_v31, 0.0  ;;  %v2861_v48 = vsel %vm631_vm0, %v2841_v0, 0.0  ;;  %v2214_v56 = vrot.slane %v5079_v4, %v3797_v8 }
 0x7e4   : > { %v4976_v11 = vadd.f32 %v2763_v9, %v2182_v54  ;;  %2865 = vadd.xlane.f32.xlu0 %v2864_v29  ;;  %v2844_v51 = vmul.f32 %v4943_v19, %v2827_v12  ;;  %v5081_v37 = vlaneseq }
 0x7e5   : > { %v2812_v53 = vadd.f32 %v2758_v34, %v2178_v39  ;;  %v3625_v13 = vpop.f32.mrb[38].mxu1  ;;  %v2843_v50 = vmul.f32 %v4943_v19, %v2826_v61 }
 0x7e6   : > { %v2773_v36 = vadd.f32 %v3625_v13, %v4930_v2  ;;  %v2767_v63 = vpop.f32.mrb[39].mxu1  ;;  %v2870_v57 = vsel %vm631_vm0, %v2844_v51, 0.0  ;;  %v2829_v49 = vmax.f32 %v4976_v11, 0.0  ;;  %v3311_v51 = vld [vmem:[%s5072_s7] ss:$0 sm:$0xff] }
 0x7e7   : > { %v2768_v44 = vadd.f32 %v2767_v63, %v4930_v2  ;;  %v2828_v28 = vmax.f32 %v2812_v53, 0.0  ;;  %v2867_v47 = vsel %vm631_vm0, %v2843_v50, 0.0 }
 0x7e8   : > { %v2815_v59 = vadd.f32 %v2773_v36, %v2190_v20  ;;  %2862 = vadd.xlane.f32.xlu0 %v2861_v48 }
 0x7e9   : > { %v2814_v23 = vadd.f32 %v2768_v44, %v2186_v45  ;;  %v3628_v26 = vpop.f32.mrb[40].mxu1  ;;  %v2845_v25 = vmul.f32 %v4943_v19, %v2828_v28 }
 0x7ea   : > { %v2831_v22 = vmax.f32 %v2815_v59, 0.0  ;;  %v2783_v1 = vadd.f32 %v3628_v26, %v4930_v2  ;;  %v2777_v17 = vpop.f32.mrb[41].mxu1  ;;  %v3725_v59 = vmov 0  }
 0x7eb   : > { %v2778_v43 = vadd.f32 %v2777_v17, %v4930_v2  ;;  %v2830_v32 = vmax.f32 %v2814_v23, 0.0  ;;  %v2873_v52 = vsel %vm631_vm0, %v2845_v25, 0.0  ;;  %3714 = vset.pattern.permute.xlu0 %v3725_v59  ;;  %3713 = vset.pattern.permute.xlu1 %v3725_v59 }
 0x7ec   : > { %v2817_v14 = vadd.f32 %v2783_v1, %v2198_v38  ;;  %2871 = vadd.xlane.f32.xlu0 %v2870_v57  ;;  %v2848_v40 = vmul.f32 %v4943_v19, %v2831_v22 }
 0x7ed   : > { %v2816_v41 = vadd.f32 %v2778_v43, %v2194_v6  ;;  %v3631_v24 = vpop.f32.mrb[42].mxu1  ;;  %v2847_v12 = vmul.f32 %v4943_v19, %v2830_v32 }
 0x7ee   : > { %v2833_v33 = vmax.f32 %v2817_v14, 0.0  ;;  %v2793_v5 = vadd.f32 %v3631_v24, %v4930_v2  ;;  %v2787_v21 = vpop.f32.mrb[43].mxu1  ;;  %v2882_v18 = vsel %vm631_vm0, %v2848_v40, 0.0 }
 0x7ef   : > { %v2832_v60 = vmax.f32 %v2816_v41, 0.0  ;;  %v2788_v35 = vadd.f32 %v2787_v21, %v4930_v2  ;;  %2883 = vadd.xlane.f32.xlu1 %v2882_v18  ;;  %v2879_v11 = vsel %vm631_vm0, %v2847_v12, 0.0 }
 0x7f0   : > { %v2819_v58 = vadd.f32 %v2793_v5, %v2206_v55  ;;  %2868 = vadd.xlane.f32.xlu0 %v2867_v47  ;;  %v2850_v62 = vmul.f32 %v4943_v19, %v2833_v33 }
 0x7f1   : > { %v2818_v27 = vadd.f32 %v2788_v35, %v2202_v16  ;;  %v3634_v10 = vpop.f32.mrb[44].mxu1  ;;  %v2849_v9 = vmul.f32 %v4943_v19, %v2832_v60 }
 0x7f2   : > { %v2835_v7 = vmax.f32 %v2819_v58, 0.0  ;;  %v2803_v31 = vadd.f32 %v3634_v10, %v4930_v2  ;;  %v2797_v15 = vpop.f32.mrb[45].mxu1  ;;  %v2888_v54 = vsel %vm631_vm0, %v2850_v62, 0.0 }
 0x7f3   : > { %v2798_v29 = vadd.f32 %v2797_v15, %v4930_v2  ;;  %2889 = vadd.xlane.f32.xlu1 %v2888_v54  ;;  %v2834_v46 = vmax.f32 %v2818_v27, 0.0  ;;  %v2885_v34 = vsel %vm631_vm0, %v2849_v9, 0.0  ;;  %v2846_v2 = vmul.f32 %v4943_v19, %v2829_v49 }
 0x7f4   : > { %v2821_v39 = vadd.f32 %v2803_v31, %v2214_v56  ;;  %2874 = vadd.xlane.f32.xlu0 %v2873_v52  ;;  %v2852_v0 = vmul.f32 %v4943_v19, %v2835_v7 }
 0x7f5   : > { %v2820_v8 = vadd.f32 %v2798_v29, %v2210_v42  ;;  %v2851_v36 = vmul.f32 %v4943_v19, %v2834_v46  ;;  %v2876_v63 = vsel %vm631_vm0, %v2846_v2, 0.0  ;;  %v2994_v42 = vand.u32 127, %v5081_v37 }
 0x7f6   : > { %v2837_v53 = vmax.f32 %v2821_v39, 0.0  ;;  %v2894_v20 = vsel %vm631_vm0, %v2852_v0, 0.0 }
 0x7f7   : > { %v2836_v13 = vmax.f32 %v2820_v8, 0.0  ;;  %2886 = vadd.xlane.f32.xlu1 %v2885_v34  ;;  %v2891_v44 = vsel %vm631_vm0, %v2851_v36, 0.0  ;;  %v2997_v15 = vsub.s32 %v2994_v42, %v3786_v3 }
 0x7f8   : > { %2880 = vadd.xlane.f32.xlu0 %v2879_v11  ;;  %v2854_v45 = vmul.f32 %v4943_v19, %v2837_v53 }
 0x7f9   : > { %v2853_v61 = vmul.f32 %v4943_v19, %v2836_v13 }
 0x7fa   : > { %v2900_v48 = vsel %vm631_vm0, %v2854_v45, 0.0 }
 0x7fb   : > { %2895 = vadd.xlane.f32.xlu1 %v2894_v20  ;;  %v2897_v23 = vsel %vm631_vm0, %v2853_v61, 0.0 }
 0x7fc   : > { %2877 = vadd.xlane.f32.xlu0 %v2876_v63 }
 0x7ff   : > { %2892 = vadd.xlane.f32.xlu1 %v2891_v44 }
 0x800   : > { %2901 = vadd.xlane.f32.xlu0 %v2900_v48 }
 0x810   : > { %2910 = vbcast.lane.b32.xlu1 %v3311_v51, 256 }
 0x834   : > { %2898 = vadd.xlane.f32.xlu1 %v2897_v23 }
 0x86c   : > { %v2860_v22 = vpop.xlane.xlu1 %2859 }
 0x86d   : > { %v2857_v26 = vpop.xlane.xlu0 %2856 }
 0x871   : > { %v2866_v19 = vpop.xlane.xlu0 %2865 }
 0x875   : > { %v2863_v38 = vpop.xlane.xlu0 %2862 }
 0x879   : > { %v2872_v17 = vpop.xlane.xlu0 %2871 }
 0x87c   : > { %v2884_v1 = vpop.xlane.xlu1 %2883 }
 0x87d   : > { %v2869_v6 = vpop.xlane.xlu0 %2868 }
 0x880   : > { %v2890_v50 = vpop.xlane.xlu1 %2889 }
 0x881   : > { %v2875_v57 = vpop.xlane.xlu0 %2874 }
 0x884   : > { %v2887_v28 = vpop.xlane.xlu1 %2886 }
 0x885   : > { %v2881_v24 = vpop.xlane.xlu0 %2880 }
 0x888   : > { %v2896_v43 = vpop.xlane.xlu1 %2895 }
 0x889   : > { %v2878_v33 = vpop.xlane.xlu0 %2877 }
 0x88c   : > { %v2893_v14 = vpop.xlane.xlu1 %2892 }
 0x88d   : > { %v2902_v32 = vpop.xlane.xlu0 %2901 }
 0x890   : > { %v2911_v40 = vpop.permute.xlu1 %2910 }
 0x891   : > { %v2914_v41 = vadd.f32 %v2911_v40, %v2860_v22  ;;  %v2913_v55 = vadd.f32 %v2911_v40, %v2857_v26  ;;  %v2916_v30 = vadd.f32 %v2911_v40, %v2866_v19  ;;  %v2918_v16 = vadd.f32 %v2911_v40, %v2872_v17 }
 0x892   : > { %v2915_v5 = vadd.f32 %v2911_v40, %v2863_v38  ;;  %v2920_v21 = vadd.f32 %v2911_v40, %v2878_v33  ;;  %v2917_v18 = vadd.f32 %v2911_v40, %v2869_v6  ;;  %v2919_v47 = vadd.f32 %v2911_v40, %v2875_v57 }
 0x893   : > { %2949 = vperm.xlu1 %3713, %v2914_v41   ;;  %2946 = vperm.xlu0 %3714, %v2913_v55   ;;  %v2922_v60 = vadd.f32 %v2911_v40, %v2884_v1  ;;  %v2928_v35 = vadd.f32 %v2911_v40, %v2902_v32  ;;  %v2921_v25 = vadd.f32 %v2911_v40, %v2881_v24 }
 0x894   : > { %v2924_v58 = vadd.f32 %v2911_v40, %v2890_v50  ;;  %v2923_v62 = vadd.f32 %v2911_v40, %v2887_v28  ;;  %v2926_v27 = vadd.f32 %v2911_v40, %v2896_v43  ;;  %v2925_v4 = vadd.f32 %v2911_v40, %v2893_v14 }
 0x897   : > { %2955 = vperm.xlu1 %3713, %v2916_v30   ;;  %2961 = vperm.xlu0 %3714, %v2918_v16  }
 0x89b   : > { %2952 = vperm.xlu1 %3713, %v2915_v5   ;;  %2967 = vperm.xlu0 %3714, %v2920_v21  }
 0x89f   : > { %2958 = vperm.xlu1 %3713, %v2917_v18   ;;  %2964 = vperm.xlu0 %3714, %v2919_v47  }
 0x8a3   : > { %2973 = vperm.xlu1 %3713, %v2922_v60   ;;  %2991 = vperm.xlu0 %3714, %v2928_v35  }
 0x8a7   : > { %2970 = vperm.xlu1 %3713, %v2921_v25  }
 0x8ab   : > { %2979 = vperm.xlu1 %3713, %v2924_v58  }
 0x8af   : > { %2976 = vperm.xlu1 %3713, %v2923_v62  }
 0x8b3   : > { %2985 = vperm.xlu1 %3713, %v2926_v27  }
 0x8b7   : > { %2982 = vperm.xlu1 %3713, %v2925_v4  }
 0x8c1   : > { %v2899_v56 = vpop.xlane.xlu1 %2898 }
 0x8c2   : > { %v2927_v10 = vadd.f32 %v2911_v40, %v2899_v56 }
 0x8c4   : > { %2988 = vperm.xlu1 %3713, %v2927_v10  }
 0x912   : > { %v2947_v7 = vpop.permute.xlu0 %2946  ;;  %v2950_v31 = vpop.permute.xlu1 %2949 }
 0x913   : > { %v2998_v49 = vrot.slane %v2947_v7, %v2997_v15  ;;  %v3002_v29 = vrot.slane %v2950_v31, %v2997_v15 }
 0x915   : > { %v3059_v8 = vsel %vm1612_vm1, %v3002_v29, %v2998_v49 }
 0x916   : > { %v2962_v54 = vpop.permute.xlu0 %2961  ;;  %v2956_v9 = vpop.permute.xlu1 %2955 }
 0x917   : > { %v3010_v34 = vrot.slane %v2956_v9, %v2997_v15  ;;  %v3018_v11 = vrot.slane %v2962_v54, %v2997_v15 }
 0x91a   : > { %v2968_v52 = vpop.permute.xlu0 %2967  ;;  %v2953_v12 = vpop.permute.xlu1 %2952 }
 0x91b   : > { %v3006_v39 = vrot.slane %v2953_v12, %v2997_v15  ;;  %v3026_v20 = vrot.slane %v2968_v52, %v2997_v15 }
 0x91d   : > { %v3060_v46 = vsel %vm1614_vm2, %v3006_v39, %v3059_v8 }
 0x91e   : > { %v2965_v0 = vpop.permute.xlu0 %2964  ;;  %v2959_v53 = vpop.permute.xlu1 %2958  ;;  %v3061_v2 = vsel %vm1616_vm3, %v3010_v34, %v3060_v46 }
 0x91f   : > { %v3014_v13 = vrot.slane %v2959_v53, %v2997_v15  ;;  %v3022_v3 = vrot.slane %v2965_v0, %v2997_v15 }
 0x921   : > { %v3062_v61 = vsel %vm1618_vm4, %v3014_v13, %v3061_v2 }
 0x922   : > { %v3063_v36 = vsel %vm1620_vm5, %v3018_v11, %v3062_v61  ;;  %v2974_v63 = vpop.permute.xlu1 %2973  ;;  %v2992_v43 = vpop.permute.xlu0 %2991 }
 0x923   : > { %v3064_v45 = vsel %vm1622_vm6, %v3022_v3, %v3063_v36  ;;  %v3034_v22 = vrot.slane %v2974_v63, %v2997_v15  ;;  %v3058_v55 = vrot.slane %v2992_v43, %v2997_v15 }
 0x924   : > { %v3065_v44 = vsel %vm1624_vm7, %v3026_v20, %v3064_v45 }
 0x925   : > { %3076 = vst.msk [vmem:[%s307_s20] sm:$0xff] %vm3075_vm8, %v3065_v44 }
 0x926   : > { %v2971_v48 = vpop.permute.xlu1 %2970 }
 0x927   : > { %v3030_v26 = vrot.slane %v2971_v48, %v2997_v15 }
 0x929   : > { %v3066_v1 = vsel %vm1612_vm1, %v3034_v22, %v3030_v26 }
 0x92a   : > { %v2980_v51 = vpop.permute.xlu1 %2979 }
 0x92b   : > { %v3042_v28 = vrot.slane %v2980_v51, %v2997_v15 }
 0x92e   : > { %v2977_v59 = vpop.permute.xlu1 %2976 }
 0x92f   : > { %v3038_v19 = vrot.slane %v2977_v59, %v2997_v15 }
 0x931   : > { %v3067_v17 = vsel %vm1614_vm2, %v3038_v19, %v3066_v1 }
 0x932   : > { %v2986_v23 = vpop.permute.xlu1 %2985  ;;  %v3068_v6 = vsel %vm1616_vm3, %v3042_v28, %v3067_v17 }
 0x933   : > { %v3050_v14 = vrot.slane %v2986_v23, %v2997_v15 }
 0x936   : > { %v2983_v38 = vpop.permute.xlu1 %2982 }
 0x937   : > { %v3046_v50 = vrot.slane %v2983_v38, %v2997_v15 }
 0x939   : > { %v3069_v57 = vsel %vm1618_vm4, %v3046_v50, %v3068_v6 }
 0x93a   : > { %v3070_v24 = vsel %vm1620_vm5, %v3050_v14, %v3069_v57 }
 0x943   : > { %v2989_v40 = vpop.permute.xlu1 %2988 }
 0x944   : > { %v3054_v41 = vrot.slane %v2989_v40, %v2997_v15 }
 0x946   : > { %v3071_v30 = vsel %vm1622_vm6, %v3054_v41, %v3070_v24 }
 0x947   : > { %v3072_v16 = vsel %vm1624_vm7, %v3058_v55, %v3071_v30 }
 0x948   : > { %3077 = vst.msk [vmem:[%s307_s20 + $0x8] sm:$0xff] %vm3075_vm8, %v3072_v16 }
 0x949 PF: > { %s18_s27 = sadd.s32 1, %s3722_s27  }
 0x94a   : > { %p15_p4 = scmp.ge.s32.totalorder %s18_s27, 4  }
 0x94c   :  { %17 = sbr.rel (!%p15_p4) target bundleno = 1 (0x1), region = 92 }

</bundles_post_ra>
